<compile_context>
chip_gen: v6e
topology: v6e:2x2x1
jax: 0.10.0
libtpu: 0.0.40
codegen_flags: <defaults>
</compile_context>

<pallas_src>
import jax
import jax.numpy as jnp
from jax import lax
from jax.experimental import pallas as pl
from jax.experimental.pallas import tpu as pltpu

KH = KW = 5
PAD = 2
CIN = 3
COUT = 32
KDIM = CIN * KH * KW  # 75
LANE = 128


def _largest_divisor_leq(n, cap):
    cap = max(1, min(n, cap))
    for d in range(cap, 0, -1):
        if n % d == 0:
            return d
    return 1


def _vmem_policy():
    """Per-generation VMEM budget (bytes per buffer set) and scoped-VMEM limit."""
    phys = None
    try:
        phys = int(pltpu.get_tpu_info().vmem_capacity_bytes)
    except Exception:
        phys = None
    if not phys or phys <= 0:
        phys = 64 * 1024 * 1024                 # conservative default (v7x per-TC VMEM)
    if phys >= 100 * 1024 * 1024:               # v5e / v6e: 128 MiB physical
        budget, limit = 20 * 1024 * 1024, 96 * 1024 * 1024
    else:                                       # v7x: 64 MiB physical
        budget, limit = 8 * 1024 * 1024, 32 * 1024 * 1024
    return budget, min(limit, (phys * 3) // 4)


def _make_kernel(W, bt, t_s, n_s_tiles):
    """Conv-as-GEMM with in-kernel im2col.

    x_ref:   (bt, 3, Sp_in)   flat, zero-padded images (resident across spatial tiles)
    w_ref:   (32, 75)         flattened OIHW weights (tap order ci, kh, kw)
    b_ref:   (32, 1)          bias
    col_ref: (1, t_s)         column-in-row index of each output lane of this tile
    o_ref:   (bt, 32, t_s)    NCHW-flat output slab (lane-dense)
    p_ref:   (75, bt*t_s)     VMEM patch slab scratch
    """

    def kernel(x_ref, w_ref, b_ref, col_ref, o_ref, p_ref):
        col = col_ref[...]                                        # (1, t_s) int32
        # kw boundary masks (kw=2 needs none); computed once per grid step.
        keep = {0: col >= 2, 1: col >= 1, 3: col <= W - 2, 4: col <= W - 3}

        w = w_ref[...]                                            # (COUT, KDIM)
        bias = jnp.broadcast_to(b_ref[...], (COUT, t_s))          # hoisted out of loops

        if n_s_tiles == 1:
            s_base = 0                                            # fully static slice offsets
        else:
            s_base = pl.multiple_of(pl.program_id(1) * t_s, LANE)

        for i in range(bt):                                       # static unroll over images
            # ---- in-kernel im2col: fill columns [i*t_s, (i+1)*t_s) of the slab ----
            for ci in range(CIN):
                for kh in range(KH):
                    for kw in range(KW):
                        tap = (ci * KH + kh) * KW + kw            # matches OIHW reshape
                        v = x_ref[i, pl.ds(ci, 1),
                                  pl.ds(s_base + kh * W + kw, t_s)]   # (1, t_s)
                        if kw != 2:
                            v = jnp.where(keep[kw], v, 0.0)
                        p_ref[pl.ds(tap, 1), pl.ds(i * t_s, t_s)] = v
            # ---- one fused K=75 MXU matmul for this image (weight stays stationary) ----
            acc = lax.dot_general(
                w, p_ref[pl.ds(0, KDIM), pl.ds(i * t_s, t_s)],
                dimension_numbers=(((1,), (0,)), ((), ())),
                preferred_element_type=jnp.float32)               # (COUT, t_s)
            o_ref[i] = (acc + bias).astype(o_ref.dtype)

    return kernel


def firstconvlayer_forward(x_nchw, w_oihw, bias):
    """Forward pass of firstconvlayer: (N, 3, H, W) -> (N, 32, H, W)."""
    N, Cin, H, W = x_nchw.shape
    assert Cin == CIN, Cin
    Cout = w_oihw.shape[0]
    S = H * W
    S_pad = pl.cdiv(S, LANE) * LANE          # lane-dense output, no masked-store fallback

    # ---- cheap wrapper-side layout glue (no 25x patch materialization) --------
    # Flat, padded input F: F[p + kh*W + kw] is the tap (kh,kw) of output pixel p
    # (row padding comes from the 2W-wide zero blocks; the +/-2 column shifts are
    # handled by the extra 2 elements on each side plus the in-kernel column mask).
    Sp_in = S_pad + 4 * W + 4
    x_flat = jnp.pad(x_nchw.reshape(N, CIN, S),
                     ((0, 0), (0, 0), (2 * W + 2, Sp_in - S - (2 * W + 2))))
    w_flat = w_oihw.reshape(Cout, KDIM)                   # (32, 75), free reshape
    b_col = bias.reshape(Cout, 1)
    col_idx = (jnp.arange(S_pad, dtype=jnp.int32) % W).reshape(1, S_pad)

    # ---- per-generation tiling -------------------------------------------------
    vmem_budget, vmem_limit = _vmem_policy()
    in_img_bytes = CIN * Sp_in * 4                        # full flat image stays resident
    col_bytes = (KDIM + 2 * COUT) * 4                     # slab + double-buffered out, per lane
    ts_cap = max(LANE, (vmem_budget - 2 * in_img_bytes) // col_bytes)
    t_s = LANE * _largest_divisor_leq(S_pad // LANE, max(1, ts_cap // LANE))
    n_s_tiles = S_pad // t_s

    per_img_bytes = 2 * in_img_bytes + col_bytes * t_s
    bt_cap = min(8, max(1, vmem_budget // per_img_bytes))
    if n_s_tiles == 1:
        bt_cap = min(bt_cap, max(1, N // 2))              # >= 2 grid steps -> feed both v7x TCs
    bt = _largest_divisor_leq(N, bt_cap)
    if N == 1 and n_s_tiles == 1 and S_pad % (2 * LANE) == 0:
        t_s = S_pad // 2                                  # single image: split S across TCs
        n_s_tiles = 2

    grid = (N // bt, n_s_tiles)
    kernel = _make_kernel(W, bt, t_s, n_s_tiles)

    out_flat = pl.pallas_call(
        kernel,
        out_shape=jax.ShapeDtypeStruct((N, Cout, S_pad), x_nchw.dtype),
        grid=grid,
        in_specs=[
            pl.BlockSpec((bt, CIN, Sp_in), lambda b, s: (b, 0, 0)),  # resident across s
            pl.BlockSpec((Cout, KDIM), lambda b, s: (0, 0)),
            pl.BlockSpec((Cout, 1), lambda b, s: (0, 0)),
            pl.BlockSpec((1, t_s), lambda b, s: (0, s)),
        ],
        out_specs=pl.BlockSpec((bt, Cout, t_s), lambda b, s: (b, 0, s)),
        scratch_shapes=[pltpu.VMEM((KDIM, bt * t_s), x_nchw.dtype)],
        compiler_params=pltpu.CompilerParams(
            dimension_semantics=("parallel", "parallel"),
            vmem_limit_bytes=vmem_limit),
    )(x_flat, w_flat, b_col, col_idx)

    out = out_flat if S_pad == S else out_flat[:, :, :S]
    # NCHW-flat -> NCHW is a free (contiguous) reshape: no output transpose pass.
    return out.reshape(N, Cout, H, W)


def _reference_conv(x_nchw, w_oihw, bias):
    out = lax.conv_general_dilated(
        x_nchw, w_oihw,
        window_strides=(1, 1),
        padding=((PAD, PAD), (PAD, PAD)),
        dimension_numbers=("NCHW", "OIHW", "NCHW"))
    return out + bias[None, :, None, None]


if __name__ == "__main__":
    key = jax.random.PRNGKey(0)
    kx, kw_, kb = jax.random.split(key, 3)

    # Small shapes consistent with the module: batch=2, Cin=3 (fixed), spatial=16.
    N, Cin, H, W = 2, 3, 16, 16

    x = jax.random.normal(kx, (N, Cin, H, W), dtype=jnp.float32)

    # Deterministic PyTorch-style init: uniform(-1/sqrt(fan_in), 1/sqrt(fan_in)).
    fan_in = CIN * KH * KW
    bound = 1.0 / (fan_in ** 0.5)
    w = jax.random.uniform(kw_, (COUT, CIN, KH, KW), jnp.float32, -bound, bound)
    b = jax.random.uniform(kb, (COUT,), jnp.float32, -bound, bound)

    fwd = jax.jit(firstconvlayer_forward)
    out = jax.block_until_ready(fwd(x, w, b))

    ref = _reference_conv(x, w, b)
    assert out.shape == (N, COUT, H, W), out.shape
    assert jnp.allclose(out, ref, atol=1e-4, rtol=1e-4), \
        float(jnp.max(jnp.abs(out - ref)))

    print("KERNEL_OK")
</pallas_src>

<mosaic_0001>
module attributes {stable_mosaic.version = 11 : i64} {
  func.func @kernel(%arg0: i32, %arg1: i32, %arg2: memref<1x3x324xf32, #tpu.memory_space<vmem>>, %arg3: memref<32x75xf32, #tpu.memory_space<vmem>>, %arg4: memref<32x1xf32, #tpu.memory_space<vmem>>, %arg5: memref<1x256xi32, #tpu.memory_space<vmem>>, %arg6: memref<1x32x256xf32, #tpu.memory_space<vmem>>, %arg7: memref<75x256xf32, #tpu.memory_space<vmem>>) attributes {dimension_semantics = [#tpu.dimension_semantics<parallel>, #tpu.dimension_semantics<parallel>], iteration_bounds = array<i64: 2, 1>, scalar_prefetch = 0 : i64, scratch_operands = 1 : i64, tpu.core_type = #tpu.core_type<tc>, window_params = [{transform_indices = @transform_0, window_bounds = array<i64: 1, 3, 324>}, {pipeline_mode = #tpu.pipeline_mode<synchronous>, transform_indices = @transform_1, window_bounds = array<i64: 32, 75>}, {pipeline_mode = #tpu.pipeline_mode<synchronous>, transform_indices = @transform_2, window_bounds = array<i64: 32, 1>}, {transform_indices = @transform_3, window_bounds = array<i64: 1, 256>}, {transform_indices = @transform_4, window_bounds = array<i64: 1, 32, 256>}]} {
    %c0 = arith.constant 0 : index
    %c0_0 = arith.constant 0 : index
    %0 = vector.load %arg5[%c0, %c0_0] : memref<1x256xi32, #tpu.memory_space<vmem>>, vector<1x256xi32>
    %c2_i32 = arith.constant 2 : i32
    %1 = vector.broadcast %c2_i32 : i32 to vector<1x256xi32>
    %2 = arith.cmpi sge, %0, %1 : vector<1x256xi32>
    %c1_i32 = arith.constant 1 : i32
    %3 = vector.broadcast %c1_i32 : i32 to vector<1x256xi32>
    %4 = arith.cmpi sge, %0, %3 : vector<1x256xi32>
    %c14_i32 = arith.constant 14 : i32
    %5 = vector.broadcast %c14_i32 : i32 to vector<1x256xi32>
    %6 = arith.cmpi sle, %0, %5 : vector<1x256xi32>
    %c13_i32 = arith.constant 13 : i32
    %7 = vector.broadcast %c13_i32 : i32 to vector<1x256xi32>
    %8 = arith.cmpi sle, %0, %7 : vector<1x256xi32>
    %c0_1 = arith.constant 0 : index
    %c0_2 = arith.constant 0 : index
    %9 = vector.load %arg3[%c0_1, %c0_2] : memref<32x75xf32, #tpu.memory_space<vmem>>, vector<32x75xf32>
    %c0_3 = arith.constant 0 : index
    %c0_4 = arith.constant 0 : index
    %10 = vector.load %arg4[%c0_3, %c0_4] : memref<32x1xf32, #tpu.memory_space<vmem>>, vector<32x1xf32>
    %11 = vector.shape_cast %10 : vector<32x1xf32> to vector<32x1xf32>
    %12 = vector.broadcast %11 : vector<32x1xf32> to vector<32x256xf32>
    %c0_5 = arith.constant 0 : index
    %c0_6 = arith.constant 0 : index
    %c0_7 = arith.constant 0 : index
    %13 = vector.load %arg2[%c0_5, %c0_6, %c0_7] : memref<1x3x324xf32, #tpu.memory_space<vmem>>, vector<1x1x256xf32>
    %14 = vector.shape_cast %13 : vector<1x1x256xf32> to vector<1x256xf32>
    %cst = arith.constant 0.000000e+00 : f32
    %15 = vector.broadcast %cst : f32 to vector<1x256xf32>
    %16 = arith.select %2, %14, %15 : vector<1x256xi1>, vector<1x256xf32>
    %c0_8 = arith.constant 0 : index
    %c0_9 = arith.constant 0 : index
    %17 = vector.load %arg7[%c0_8, %c0_9] : memref<75x256xf32, #tpu.memory_space<vmem>>, vector<1x256xf32>
    tpu.vector_store %arg7[%c0_8, %c0_9], %16 {strides = array<i32>} : memref<75x256xf32, #tpu.memory_space<vmem>>, vector<1x256xf32>,
    %c0_10 = arith.constant 0 : index
    %c0_11 = arith.constant 0 : index
    %c1 = arith.constant 1 : index
    %18 = vector.load %arg2[%c0_10, %c0_11, %c1] : memref<1x3x324xf32, #tpu.memory_space<vmem>>, vector<1x1x256xf32>
    %19 = vector.shape_cast %18 : vector<1x1x256xf32> to vector<1x256xf32>
    %cst_12 = arith.constant 0.000000e+00 : f32
    %20 = vector.broadcast %cst_12 : f32 to vector<1x256xf32>
    %21 = arith.select %4, %19, %20 : vector<1x256xi1>, vector<1x256xf32>
    %c1_13 = arith.constant 1 : index
    %c0_14 = arith.constant 0 : index
    %22 = vector.load %arg7[%c1_13, %c0_14] : memref<75x256xf32, #tpu.memory_space<vmem>>, vector<1x256xf32>
    tpu.vector_store %arg7[%c1_13, %c0_14], %21 {strides = array<i32>} : memref<75x256xf32, #tpu.memory_space<vmem>>, vector<1x256xf32>,
    %c0_15 = arith.constant 0 : index
    %c0_16 = arith.constant 0 : index
    %c2 = arith.constant 2 : index
    %23 = vector.load %arg2[%c0_15, %c0_16, %c2] : memref<1x3x324xf32, #tpu.memory_space<vmem>>, vector<1x1x256xf32>
    %24 = vector.shape_cast %23 : vector<1x1x256xf32> to vector<1x256xf32>
    %c2_17 = arith.constant 2 : index
    %c0_18 = arith.constant 0 : index
    %25 = vector.load %arg7[%c2_17, %c0_18] : memref<75x256xf32, #tpu.memory_space<vmem>>, vector<1x256xf32>
    tpu.vector_store %arg7[%c2_17, %c0_18], %24 {strides = array<i32>} : memref<75x256xf32, #tpu.memory_space<vmem>>, vector<1x256xf32>,
    %c0_19 = arith.constant 0 : index
    %c0_20 = arith.constant 0 : index
    %c3 = arith.constant 3 : index
    %26 = vector.load %arg2[%c0_19, %c0_20, %c3] : memref<1x3x324xf32, #tpu.memory_space<vmem>>, vector<1x1x256xf32>
    %27 = vector.shape_cast %26 : vector<1x1x256xf32> to vector<1x256xf32>
    %cst_21 = arith.constant 0.000000e+00 : f32
    %28 = vector.broadcast %cst_21 : f32 to vector<1x256xf32>
    %29 = arith.select %6, %27, %28 : vector<1x256xi1>, vector<1x256xf32>
    %c3_22 = arith.constant 3 : index
    %c0_23 = arith.constant 0 : index
    %30 = vector.load %arg7[%c3_22, %c0_23] : memref<75x256xf32, #tpu.memory_space<vmem>>, vector<1x256xf32>
    tpu.vector_store %arg7[%c3_22, %c0_23], %29 {strides = array<i32>} : memref<75x256xf32, #tpu.memory_space<vmem>>, vector<1x256xf32>,
    %c0_24 = arith.constant 0 : index
    %c0_25 = arith.constant 0 : index
    %c4 = arith.constant 4 : index
    %31 = vector.load %arg2[%c0_24, %c0_25, %c4] : memref<1x3x324xf32, #tpu.memory_space<vmem>>, vector<1x1x256xf32>
    %32 = vector.shape_cast %31 : vector<1x1x256xf32> to vector<1x256xf32>
    %cst_26 = arith.constant 0.000000e+00 : f32
    %33 = vector.broadcast %cst_26 : f32 to vector<1x256xf32>
    %34 = arith.select %8, %32, %33 : vector<1x256xi1>, vector<1x256xf32>
    %c4_27 = arith.constant 4 : index
    %c0_28 = arith.constant 0 : index
    %35 = vector.load %arg7[%c4_27, %c0_28] : memref<75x256xf32, #tpu.memory_space<vmem>>, vector<1x256xf32>
    tpu.vector_store %arg7[%c4_27, %c0_28], %34 {strides = array<i32>} : memref<75x256xf32, #tpu.memory_space<vmem>>, vector<1x256xf32>,
    %c0_29 = arith.constant 0 : index
    %c0_30 = arith.constant 0 : index
    %c16 = arith.constant 16 : index
    %36 = vector.load %arg2[%c0_29, %c0_30, %c16] : memref<1x3x324xf32, #tpu.memory_space<vmem>>, vector<1x1x256xf32>
    %37 = vector.shape_cast %36 : vector<1x1x256xf32> to vector<1x256xf32>
    %cst_31 = arith.constant 0.000000e+00 : f32
    %38 = vector.broadcast %cst_31 : f32 to vector<1x256xf32>
    %39 = arith.select %2, %37, %38 : vector<1x256xi1>, vector<1x256xf32>
    %c5 = arith.constant 5 : index
    %c0_32 = arith.constant 0 : index
    %40 = vector.load %arg7[%c5, %c0_32] : memref<75x256xf32, #tpu.memory_space<vmem>>, vector<1x256xf32>
    tpu.vector_store %arg7[%c5, %c0_32], %39 {strides = array<i32>} : memref<75x256xf32, #tpu.memory_space<vmem>>, vector<1x256xf32>,
    %c0_33 = arith.constant 0 : index
    %c0_34 = arith.constant 0 : index
    %c17 = arith.constant 17 : index
    %41 = vector.load %arg2[%c0_33, %c0_34, %c17] : memref<1x3x324xf32, #tpu.memory_space<vmem>>, vector<1x1x256xf32>
    %42 = vector.shape_cast %41 : vector<1x1x256xf32> to vector<1x256xf32>
    %cst_35 = arith.constant 0.000000e+00 : f32
    %43 = vector.broadcast %cst_35 : f32 to vector<1x256xf32>
    %44 = arith.select %4, %42, %43 : vector<1x256xi1>, vector<1x256xf32>
    %c6 = arith.constant 6 : index
    %c0_36 = arith.constant 0 : index
    %45 = vector.load %arg7[%c6, %c0_36] : memref<75x256xf32, #tpu.memory_space<vmem>>, vector<1x256xf32>
    tpu.vector_store %arg7[%c6, %c0_36], %44 {strides = array<i32>} : memref<75x256xf32, #tpu.memory_space<vmem>>, vector<1x256xf32>,
    %c0_37 = arith.constant 0 : index
    %c0_38 = arith.constant 0 : index
    %c18 = arith.constant 18 : index
    %46 = vector.load %arg2[%c0_37, %c0_38, %c18] : memref<1x3x324xf32, #tpu.memory_space<vmem>>, vector<1x1x256xf32>
    %47 = vector.shape_cast %46 : vector<1x1x256xf32> to vector<1x256xf32>
    %c7 = arith.constant 7 : index
    %c0_39 = arith.constant 0 : index
    %48 = vector.load %arg7[%c7, %c0_39] : memref<75x256xf32, #tpu.memory_space<vmem>>, vector<1x256xf32>
    tpu.vector_store %arg7[%c7, %c0_39], %47 {strides = array<i32>} : memref<75x256xf32, #tpu.memory_space<vmem>>, vector<1x256xf32>,
    %c0_40 = arith.constant 0 : index
    %c0_41 = arith.constant 0 : index
    %c19 = arith.constant 19 : index
    %49 = vector.load %arg2[%c0_40, %c0_41, %c19] : memref<1x3x324xf32, #tpu.memory_space<vmem>>, vector<1x1x256xf32>
    %50 = vector.shape_cast %49 : vector<1x1x256xf32> to vector<1x256xf32>
    %cst_42 = arith.constant 0.000000e+00 : f32
    %51 = vector.broadcast %cst_42 : f32 to vector<1x256xf32>
    %52 = arith.select %6, %50, %51 : vector<1x256xi1>, vector<1x256xf32>
    %c8 = arith.constant 8 : index
    %c0_43 = arith.constant 0 : index
    %53 = vector.load %arg7[%c8, %c0_43] : memref<75x256xf32, #tpu.memory_space<vmem>>, vector<1x256xf32>
    tpu.vector_store %arg7[%c8, %c0_43], %52 {strides = array<i32>} : memref<75x256xf32, #tpu.memory_space<vmem>>, vector<1x256xf32>,
    %c0_44 = arith.constant 0 : index
    %c0_45 = arith.constant 0 : index
    %c20 = arith.constant 20 : index
    %54 = vector.load %arg2[%c0_44, %c0_45, %c20] : memref<1x3x324xf32, #tpu.memory_space<vmem>>, vector<1x1x256xf32>
    %55 = vector.shape_cast %54 : vector<1x1x256xf32> to vector<1x256xf32>
    %cst_46 = arith.constant 0.000000e+00 : f32
    %56 = vector.broadcast %cst_46 : f32 to vector<1x256xf32>
    %57 = arith.select %8, %55, %56 : vector<1x256xi1>, vector<1x256xf32>
    %c9 = arith.constant 9 : index
    %c0_47 = arith.constant 0 : index
    %58 = vector.load %arg7[%c9, %c0_47] : memref<75x256xf32, #tpu.memory_space<vmem>>, vector<1x256xf32>
    tpu.vector_store %arg7[%c9, %c0_47], %57 {strides = array<i32>} : memref<75x256xf32, #tpu.memory_space<vmem>>, vector<1x256xf32>,
    %c0_48 = arith.constant 0 : index
    %c0_49 = arith.constant 0 : index
    %c32 = arith.constant 32 : index
    %59 = vector.load %arg2[%c0_48, %c0_49, %c32] : memref<1x3x324xf32, #tpu.memory_space<vmem>>, vector<1x1x256xf32>
    %60 = vector.shape_cast %59 : vector<1x1x256xf32> to vector<1x256xf32>
    %cst_50 = arith.constant 0.000000e+00 : f32
    %61 = vector.broadcast %cst_50 : f32 to vector<1x256xf32>
    %62 = arith.select %2, %60, %61 : vector<1x256xi1>, vector<1x256xf32>
    %c10 = arith.constant 10 : index
    %c0_51 = arith.constant 0 : index
    %63 = vector.load %arg7[%c10, %c0_51] : memref<75x256xf32, #tpu.memory_space<vmem>>, vector<1x256xf32>
    tpu.vector_store %arg7[%c10, %c0_51], %62 {strides = array<i32>} : memref<75x256xf32, #tpu.memory_space<vmem>>, vector<1x256xf32>,
    %c0_52 = arith.constant 0 : index
    %c0_53 = arith.constant 0 : index
    %c33 = arith.constant 33 : index
    %64 = vector.load %arg2[%c0_52, %c0_53, %c33] : memref<1x3x324xf32, #tpu.memory_space<vmem>>, vector<1x1x256xf32>
    %65 = vector.shape_cast %64 : vector<1x1x256xf32> to vector<1x256xf32>
    %cst_54 = arith.constant 0.000000e+00 : f32
    %66 = vector.broadcast %cst_54 : f32 to vector<1x256xf32>
    %67 = arith.select %4, %65, %66 : vector<1x256xi1>, vector<1x256xf32>
    %c11 = arith.constant 11 : index
    %c0_55 = arith.constant 0 : index
    %68 = vector.load %arg7[%c11, %c0_55] : memref<75x256xf32, #tpu.memory_space<vmem>>, vector<1x256xf32>
    tpu.vector_store %arg7[%c11, %c0_55], %67 {strides = array<i32>} : memref<75x256xf32, #tpu.memory_space<vmem>>, vector<1x256xf32>,
    %c0_56 = arith.constant 0 : index
    %c0_57 = arith.constant 0 : index
    %c34 = arith.constant 34 : index
    %69 = vector.load %arg2[%c0_56, %c0_57, %c34] : memref<1x3x324xf32, #tpu.memory_space<vmem>>, vector<1x1x256xf32>
    %70 = vector.shape_cast %69 : vector<1x1x256xf32> to vector<1x256xf32>
    %c12 = arith.constant 12 : index
    %c0_58 = arith.constant 0 : index
    %71 = vector.load %arg7[%c12, %c0_58] : memref<75x256xf32, #tpu.memory_space<vmem>>, vector<1x256xf32>
    tpu.vector_store %arg7[%c12, %c0_58], %70 {strides = array<i32>} : memref<75x256xf32, #tpu.memory_space<vmem>>, vector<1x256xf32>,
    %c0_59 = arith.constant 0 : index
    %c0_60 = arith.constant 0 : index
    %c35 = arith.constant 35 : index
    %72 = vector.load %arg2[%c0_59, %c0_60, %c35] : memref<1x3x324xf32, #tpu.memory_space<vmem>>, vector<1x1x256xf32>
    %73 = vector.shape_cast %72 : vector<1x1x256xf32> to vector<1x256xf32>
    %cst_61 = arith.constant 0.000000e+00 : f32
    %74 = vector.broadcast %cst_61 : f32 to vector<1x256xf32>
    %75 = arith.select %6, %73, %74 : vector<1x256xi1>, vector<1x256xf32>
    %c13 = arith.constant 13 : index
    %c0_62 = arith.constant 0 : index
    %76 = vector.load %arg7[%c13, %c0_62] : memref<75x256xf32, #tpu.memory_space<vmem>>, vector<1x256xf32>
    tpu.vector_store %arg7[%c13, %c0_62], %75 {strides = array<i32>} : memref<75x256xf32, #tpu.memory_space<vmem>>, vector<1x256xf32>,
    %c0_63 = arith.constant 0 : index
    %c0_64 = arith.constant 0 : index
    %c36 = arith.constant 36 : index
    %77 = vector.load %arg2[%c0_63, %c0_64, %c36] : memref<1x3x324xf32, #tpu.memory_space<vmem>>, vector<1x1x256xf32>
    %78 = vector.shape_cast %77 : vector<1x1x256xf32> to vector<1x256xf32>
    %cst_65 = arith.constant 0.000000e+00 : f32
    %79 = vector.broadcast %cst_65 : f32 to vector<1x256xf32>
    %80 = arith.select %8, %78, %79 : vector<1x256xi1>, vector<1x256xf32>
    %c14 = arith.constant 14 : index
    %c0_66 = arith.constant 0 : index
    %81 = vector.load %arg7[%c14, %c0_66] : memref<75x256xf32, #tpu.memory_space<vmem>>, vector<1x256xf32>
    tpu.vector_store %arg7[%c14, %c0_66], %80 {strides = array<i32>} : memref<75x256xf32, #tpu.memory_space<vmem>>, vector<1x256xf32>,
    %c0_67 = arith.constant 0 : index
    %c0_68 = arith.constant 0 : index
    %c48 = arith.constant 48 : index
    %82 = vector.load %arg2[%c0_67, %c0_68, %c48] : memref<1x3x324xf32, #tpu.memory_space<vmem>>, vector<1x1x256xf32>
    %83 = vector.shape_cast %82 : vector<1x1x256xf32> to vector<1x256xf32>
    %cst_69 = arith.constant 0.000000e+00 : f32
    %84 = vector.broadcast %cst_69 : f32 to vector<1x256xf32>
    %85 = arith.select %2, %83, %84 : vector<1x256xi1>, vector<1x256xf32>
    %c15 = arith.constant 15 : index
    %c0_70 = arith.constant 0 : index
    %86 = vector.load %arg7[%c15, %c0_70] : memref<75x256xf32, #tpu.memory_space<vmem>>, vector<1x256xf32>
    tpu.vector_store %arg7[%c15, %c0_70], %85 {strides = array<i32>} : memref<75x256xf32, #tpu.memory_space<vmem>>, vector<1x256xf32>,
    %c0_71 = arith.constant 0 : index
    %c0_72 = arith.constant 0 : index
    %c49 = arith.constant 49 : index
    %87 = vector.load %arg2[%c0_71, %c0_72, %c49] : memref<1x3x324xf32, #tpu.memory_space<vmem>>, vector<1x1x256xf32>
    %88 = vector.shape_cast %87 : vector<1x1x256xf32> to vector<1x256xf32>
    %cst_73 = arith.constant 0.000000e+00 : f32
    %89 = vector.broadcast %cst_73 : f32 to vector<1x256xf32>
    %90 = arith.select %4, %88, %89 : vector<1x256xi1>, vector<1x256xf32>
    %c16_74 = arith.constant 16 : index
    %c0_75 = arith.constant 0 : index
    %91 = vector.load %arg7[%c16_74, %c0_75] : memref<75x256xf32, #tpu.memory_space<vmem>>, vector<1x256xf32>
    tpu.vector_store %arg7[%c16_74, %c0_75], %90 {strides = array<i32>} : memref<75x256xf32, #tpu.memory_space<vmem>>, vector<1x256xf32>,
    %c0_76 = arith.constant 0 : index
    %c0_77 = arith.constant 0 : index
    %c50 = arith.constant 50 : index
    %92 = vector.load %arg2[%c0_76, %c0_77, %c50] : memref<1x3x324xf32, #tpu.memory_space<vmem>>, vector<1x1x256xf32>
    %93 = vector.shape_cast %92 : vector<1x1x256xf32> to vector<1x256xf32>
    %c17_78 = arith.constant 17 : index
    %c0_79 = arith.constant 0 : index
    %94 = vector.load %arg7[%c17_78, %c0_79] : memref<75x256xf32, #tpu.memory_space<vmem>>, vector<1x256xf32>
    tpu.vector_store %arg7[%c17_78, %c0_79], %93 {strides = array<i32>} : memref<75x256xf32, #tpu.memory_space<vmem>>, vector<1x256xf32>,
    %c0_80 = arith.constant 0 : index
    %c0_81 = arith.constant 0 : index
    %c51 = arith.constant 51 : index
    %95 = vector.load %arg2[%c0_80, %c0_81, %c51] : memref<1x3x324xf32, #tpu.memory_space<vmem>>, vector<1x1x256xf32>
    %96 = vector.shape_cast %95 : vector<1x1x256xf32> to vector<1x256xf32>
    %cst_82 = arith.constant 0.000000e+00 : f32
    %97 = vector.broadcast %cst_82 : f32 to vector<1x256xf32>
    %98 = arith.select %6, %96, %97 : vector<1x256xi1>, vector<1x256xf32>
    %c18_83 = arith.constant 18 : index
    %c0_84 = arith.constant 0 : index
    %99 = vector.load %arg7[%c18_83, %c0_84] : memref<75x256xf32, #tpu.memory_space<vmem>>, vector<1x256xf32>
    tpu.vector_store %arg7[%c18_83, %c0_84], %98 {strides = array<i32>} : memref<75x256xf32, #tpu.memory_space<vmem>>, vector<1x256xf32>,
    %c0_85 = arith.constant 0 : index
    %c0_86 = arith.constant 0 : index
    %c52 = arith.constant 52 : index
    %100 = vector.load %arg2[%c0_85, %c0_86, %c52] : memref<1x3x324xf32, #tpu.memory_space<vmem>>, vector<1x1x256xf32>
    %101 = vector.shape_cast %100 : vector<1x1x256xf32> to vector<1x256xf32>
    %cst_87 = arith.constant 0.000000e+00 : f32
    %102 = vector.broadcast %cst_87 : f32 to vector<1x256xf32>
    %103 = arith.select %8, %101, %102 : vector<1x256xi1>, vector<1x256xf32>
    %c19_88 = arith.constant 19 : index
    %c0_89 = arith.constant 0 : index
    %104 = vector.load %arg7[%c19_88, %c0_89] : memref<75x256xf32, #tpu.memory_space<vmem>>, vector<1x256xf32>
    tpu.vector_store %arg7[%c19_88, %c0_89], %103 {strides = array<i32>} : memref<75x256xf32, #tpu.memory_space<vmem>>, vector<1x256xf32>,
    %c0_90 = arith.constant 0 : index
    %c0_91 = arith.constant 0 : index
    %c64 = arith.constant 64 : index
    %105 = vector.load %arg2[%c0_90, %c0_91, %c64] : memref<1x3x324xf32, #tpu.memory_space<vmem>>, vector<1x1x256xf32>
    %106 = vector.shape_cast %105 : vector<1x1x256xf32> to vector<1x256xf32>
    %cst_92 = arith.constant 0.000000e+00 : f32
    %107 = vector.broadcast %cst_92 : f32 to vector<1x256xf32>
    %108 = arith.select %2, %106, %107 : vector<1x256xi1>, vector<1x256xf32>
    %c20_93 = arith.constant 20 : index
    %c0_94 = arith.constant 0 : index
    %109 = vector.load %arg7[%c20_93, %c0_94] : memref<75x256xf32, #tpu.memory_space<vmem>>, vector<1x256xf32>
    tpu.vector_store %arg7[%c20_93, %c0_94], %108 {strides = array<i32>} : memref<75x256xf32, #tpu.memory_space<vmem>>, vector<1x256xf32>,
    %c0_95 = arith.constant 0 : index
    %c0_96 = arith.constant 0 : index
    %c65 = arith.constant 65 : index
    %110 = vector.load %arg2[%c0_95, %c0_96, %c65] : memref<1x3x324xf32, #tpu.memory_space<vmem>>, vector<1x1x256xf32>
    %111 = vector.shape_cast %110 : vector<1x1x256xf32> to vector<1x256xf32>
    %cst_97 = arith.constant 0.000000e+00 : f32
    %112 = vector.broadcast %cst_97 : f32 to vector<1x256xf32>
    %113 = arith.select %4, %111, %112 : vector<1x256xi1>, vector<1x256xf32>
    %c21 = arith.constant 21 : index
    %c0_98 = arith.constant 0 : index
    %114 = vector.load %arg7[%c21, %c0_98] : memref<75x256xf32, #tpu.memory_space<vmem>>, vector<1x256xf32>
    tpu.vector_store %arg7[%c21, %c0_98], %113 {strides = array<i32>} : memref<75x256xf32, #tpu.memory_space<vmem>>, vector<1x256xf32>,
    %c0_99 = arith.constant 0 : index
    %c0_100 = arith.constant 0 : index
    %c66 = arith.constant 66 : index
    %115 = vector.load %arg2[%c0_99, %c0_100, %c66] : memref<1x3x324xf32, #tpu.memory_space<vmem>>, vector<1x1x256xf32>
    %116 = vector.shape_cast %115 : vector<1x1x256xf32> to vector<1x256xf32>
    %c22 = arith.constant 22 : index
    %c0_101 = arith.constant 0 : index
    %117 = vector.load %arg7[%c22, %c0_101] : memref<75x256xf32, #tpu.memory_space<vmem>>, vector<1x256xf32>
    tpu.vector_store %arg7[%c22, %c0_101], %116 {strides = array<i32>} : memref<75x256xf32, #tpu.memory_space<vmem>>, vector<1x256xf32>,
    %c0_102 = arith.constant 0 : index
    %c0_103 = arith.constant 0 : index
    %c67 = arith.constant 67 : index
    %118 = vector.load %arg2[%c0_102, %c0_103, %c67] : memref<1x3x324xf32, #tpu.memory_space<vmem>>, vector<1x1x256xf32>
    %119 = vector.shape_cast %118 : vector<1x1x256xf32> to vector<1x256xf32>
    %cst_104 = arith.constant 0.000000e+00 : f32
    %120 = vector.broadcast %cst_104 : f32 to vector<1x256xf32>
    %121 = arith.select %6, %119, %120 : vector<1x256xi1>, vector<1x256xf32>
    %c23 = arith.constant 23 : index
    %c0_105 = arith.constant 0 : index
    %122 = vector.load %arg7[%c23, %c0_105] : memref<75x256xf32, #tpu.memory_space<vmem>>, vector<1x256xf32>
    tpu.vector_store %arg7[%c23, %c0_105], %121 {strides = array<i32>} : memref<75x256xf32, #tpu.memory_space<vmem>>, vector<1x256xf32>,
    %c0_106 = arith.constant 0 : index
    %c0_107 = arith.constant 0 : index
    %c68 = arith.constant 68 : index
    %123 = vector.load %arg2[%c0_106, %c0_107, %c68] : memref<1x3x324xf32, #tpu.memory_space<vmem>>, vector<1x1x256xf32>
    %124 = vector.shape_cast %123 : vector<1x1x256xf32> to vector<1x256xf32>
    %cst_108 = arith.constant 0.000000e+00 : f32
    %125 = vector.broadcast %cst_108 : f32 to vector<1x256xf32>
    %126 = arith.select %8, %124, %125 : vector<1x256xi1>, vector<1x256xf32>
    %c24 = arith.constant 24 : index
    %c0_109 = arith.constant 0 : index
    %127 = vector.load %arg7[%c24, %c0_109] : memref<75x256xf32, #tpu.memory_space<vmem>>, vector<1x256xf32>
    tpu.vector_store %arg7[%c24, %c0_109], %126 {strides = array<i32>} : memref<75x256xf32, #tpu.memory_space<vmem>>, vector<1x256xf32>,
    %c0_110 = arith.constant 0 : index
    %c1_111 = arith.constant 1 : index
    %c0_112 = arith.constant 0 : index
    %128 = vector.load %arg2[%c0_110, %c1_111, %c0_112] : memref<1x3x324xf32, #tpu.memory_space<vmem>>, vector<1x1x256xf32>
    %129 = vector.shape_cast %128 : vector<1x1x256xf32> to vector<1x256xf32>
    %cst_113 = arith.constant 0.000000e+00 : f32
    %130 = vector.broadcast %cst_113 : f32 to vector<1x256xf32>
    %131 = arith.select %2, %129, %130 : vector<1x256xi1>, vector<1x256xf32>
    %c25 = arith.constant 25 : index
    %c0_114 = arith.constant 0 : index
    %132 = vector.load %arg7[%c25, %c0_114] : memref<75x256xf32, #tpu.memory_space<vmem>>, vector<1x256xf32>
    tpu.vector_store %arg7[%c25, %c0_114], %131 {strides = array<i32>} : memref<75x256xf32, #tpu.memory_space<vmem>>, vector<1x256xf32>,
    %c0_115 = arith.constant 0 : index
    %c1_116 = arith.constant 1 : index
    %c1_117 = arith.constant 1 : index
    %133 = vector.load %arg2[%c0_115, %c1_116, %c1_117] : memref<1x3x324xf32, #tpu.memory_space<vmem>>, vector<1x1x256xf32>
    %134 = vector.shape_cast %133 : vector<1x1x256xf32> to vector<1x256xf32>
    %cst_118 = arith.constant 0.000000e+00 : f32
    %135 = vector.broadcast %cst_118 : f32 to vector<1x256xf32>
    %136 = arith.select %4, %134, %135 : vector<1x256xi1>, vector<1x256xf32>
    %c26 = arith.constant 26 : index
    %c0_119 = arith.constant 0 : index
    %137 = vector.load %arg7[%c26, %c0_119] : memref<75x256xf32, #tpu.memory_space<vmem>>, vector<1x256xf32>
    tpu.vector_store %arg7[%c26, %c0_119], %136 {strides = array<i32>} : memref<75x256xf32, #tpu.memory_space<vmem>>, vector<1x256xf32>,
    %c0_120 = arith.constant 0 : index
    %c1_121 = arith.constant 1 : index
    %c2_122 = arith.constant 2 : index
    %138 = vector.load %arg2[%c0_120, %c1_121, %c2_122] : memref<1x3x324xf32, #tpu.memory_space<vmem>>, vector<1x1x256xf32>
    %139 = vector.shape_cast %138 : vector<1x1x256xf32> to vector<1x256xf32>
    %c27 = arith.constant 27 : index
    %c0_123 = arith.constant 0 : index
    %140 = vector.load %arg7[%c27, %c0_123] : memref<75x256xf32, #tpu.memory_space<vmem>>, vector<1x256xf32>
    tpu.vector_store %arg7[%c27, %c0_123], %139 {strides = array<i32>} : memref<75x256xf32, #tpu.memory_space<vmem>>, vector<1x256xf32>,
    %c0_124 = arith.constant 0 : index
    %c1_125 = arith.constant 1 : index
    %c3_126 = arith.constant 3 : index
    %141 = vector.load %arg2[%c0_124, %c1_125, %c3_126] : memref<1x3x324xf32, #tpu.memory_space<vmem>>, vector<1x1x256xf32>
    %142 = vector.shape_cast %141 : vector<1x1x256xf32> to vector<1x256xf32>
    %cst_127 = arith.constant 0.000000e+00 : f32
    %143 = vector.broadcast %cst_127 : f32 to vector<1x256xf32>
    %144 = arith.select %6, %142, %143 : vector<1x256xi1>, vector<1x256xf32>
    %c28 = arith.constant 28 : index
    %c0_128 = arith.constant 0 : index
    %145 = vector.load %arg7[%c28, %c0_128] : memref<75x256xf32, #tpu.memory_space<vmem>>, vector<1x256xf32>
    tpu.vector_store %arg7[%c28, %c0_128], %144 {strides = array<i32>} : memref<75x256xf32, #tpu.memory_space<vmem>>, vector<1x256xf32>,
    %c0_129 = arith.constant 0 : index
    %c1_130 = arith.constant 1 : index
    %c4_131 = arith.constant 4 : index
    %146 = vector.load %arg2[%c0_129, %c1_130, %c4_131] : memref<1x3x324xf32, #tpu.memory_space<vmem>>, vector<1x1x256xf32>
    %147 = vector.shape_cast %146 : vector<1x1x256xf32> to vector<1x256xf32>
    %cst_132 = arith.constant 0.000000e+00 : f32
    %148 = vector.broadcast %cst_132 : f32 to vector<1x256xf32>
    %149 = arith.select %8, %147, %148 : vector<1x256xi1>, vector<1x256xf32>
    %c29 = arith.constant 29 : index
    %c0_133 = arith.constant 0 : index
    %150 = vector.load %arg7[%c29, %c0_133] : memref<75x256xf32, #tpu.memory_space<vmem>>, vector<1x256xf32>
    tpu.vector_store %arg7[%c29, %c0_133], %149 {strides = array<i32>} : memref<75x256xf32, #tpu.memory_space<vmem>>, vector<1x256xf32>,
    %c0_134 = arith.constant 0 : index
    %c1_135 = arith.constant 1 : index
    %c16_136 = arith.constant 16 : index
    %151 = vector.load %arg2[%c0_134, %c1_135, %c16_136] : memref<1x3x324xf32, #tpu.memory_space<vmem>>, vector<1x1x256xf32>
    %152 = vector.shape_cast %151 : vector<1x1x256xf32> to vector<1x256xf32>
    %cst_137 = arith.constant 0.000000e+00 : f32
    %153 = vector.broadcast %cst_137 : f32 to vector<1x256xf32>
    %154 = arith.select %2, %152, %153 : vector<1x256xi1>, vector<1x256xf32>
    %c30 = arith.constant 30 : index
    %c0_138 = arith.constant 0 : index
    %155 = vector.load %arg7[%c30, %c0_138] : memref<75x256xf32, #tpu.memory_space<vmem>>, vector<1x256xf32>
    tpu.vector_store %arg7[%c30, %c0_138], %154 {strides = array<i32>} : memref<75x256xf32, #tpu.memory_space<vmem>>, vector<1x256xf32>,
    %c0_139 = arith.constant 0 : index
    %c1_140 = arith.constant 1 : index
    %c17_141 = arith.constant 17 : index
    %156 = vector.load %arg2[%c0_139, %c1_140, %c17_141] : memref<1x3x324xf32, #tpu.memory_space<vmem>>, vector<1x1x256xf32>
    %157 = vector.shape_cast %156 : vector<1x1x256xf32> to vector<1x256xf32>
    %cst_142 = arith.constant 0.000000e+00 : f32
    %158 = vector.broadcast %cst_142 : f32 to vector<1x256xf32>
    %159 = arith.select %4, %157, %158 : vector<1x256xi1>, vector<1x256xf32>
    %c31 = arith.constant 31 : index
    %c0_143 = arith.constant 0 : index
    %160 = vector.load %arg7[%c31, %c0_143] : memref<75x256xf32, #tpu.memory_space<vmem>>, vector<1x256xf32>
    tpu.vector_store %arg7[%c31, %c0_143], %159 {strides = array<i32>} : memref<75x256xf32, #tpu.memory_space<vmem>>, vector<1x256xf32>,
    %c0_144 = arith.constant 0 : index
    %c1_145 = arith.constant 1 : index
    %c18_146 = arith.constant 18 : index
    %161 = vector.load %arg2[%c0_144, %c1_145, %c18_146] : memref<1x3x324xf32, #tpu.memory_space<vmem>>, vector<1x1x256xf32>
    %162 = vector.shape_cast %161 : vector<1x1x256xf32> to vector<1x256xf32>
    %c32_147 = arith.constant 32 : index
    %c0_148 = arith.constant 0 : index
    %163 = vector.load %arg7[%c32_147, %c0_148] : memref<75x256xf32, #tpu.memory_space<vmem>>, vector<1x256xf32>
    tpu.vector_store %arg7[%c32_147, %c0_148], %162 {strides = array<i32>} : memref<75x256xf32, #tpu.memory_space<vmem>>, vector<1x256xf32>,
    %c0_149 = arith.constant 0 : index
    %c1_150 = arith.constant 1 : index
    %c19_151 = arith.constant 19 : index
    %164 = vector.load %arg2[%c0_149, %c1_150, %c19_151] : memref<1x3x324xf32, #tpu.memory_space<vmem>>, vector<1x1x256xf32>
    %165 = vector.shape_cast %164 : vector<1x1x256xf32> to vector<1x256xf32>
    %cst_152 = arith.constant 0.000000e+00 : f32
    %166 = vector.broadcast %cst_152 : f32 to vector<1x256xf32>
    %167 = arith.select %6, %165, %166 : vector<1x256xi1>, vector<1x256xf32>
    %c33_153 = arith.constant 33 : index
    %c0_154 = arith.constant 0 : index
    %168 = vector.load %arg7[%c33_153, %c0_154] : memref<75x256xf32, #tpu.memory_space<vmem>>, vector<1x256xf32>
    tpu.vector_store %arg7[%c33_153, %c0_154], %167 {strides = array<i32>} : memref<75x256xf32, #tpu.memory_space<vmem>>, vector<1x256xf32>,
    %c0_155 = arith.constant 0 : index
    %c1_156 = arith.constant 1 : index
    %c20_157 = arith.constant 20 : index
    %169 = vector.load %arg2[%c0_155, %c1_156, %c20_157] : memref<1x3x324xf32, #tpu.memory_space<vmem>>, vector<1x1x256xf32>
    %170 = vector.shape_cast %169 : vector<1x1x256xf32> to vector<1x256xf32>
    %cst_158 = arith.constant 0.000000e+00 : f32
    %171 = vector.broadcast %cst_158 : f32 to vector<1x256xf32>
    %172 = arith.select %8, %170, %171 : vector<1x256xi1>, vector<1x256xf32>
    %c34_159 = arith.constant 34 : index
    %c0_160 = arith.constant 0 : index
    %173 = vector.load %arg7[%c34_159, %c0_160] : memref<75x256xf32, #tpu.memory_space<vmem>>, vector<1x256xf32>
    tpu.vector_store %arg7[%c34_159, %c0_160], %172 {strides = array<i32>} : memref<75x256xf32, #tpu.memory_space<vmem>>, vector<1x256xf32>,
    %c0_161 = arith.constant 0 : index
    %c1_162 = arith.constant 1 : index
    %c32_163 = arith.constant 32 : index
    %174 = vector.load %arg2[%c0_161, %c1_162, %c32_163] : memref<1x3x324xf32, #tpu.memory_space<vmem>>, vector<1x1x256xf32>
    %175 = vector.shape_cast %174 : vector<1x1x256xf32> to vector<1x256xf32>
    %cst_164 = arith.constant 0.000000e+00 : f32
    %176 = vector.broadcast %cst_164 : f32 to vector<1x256xf32>
    %177 = arith.select %2, %175, %176 : vector<1x256xi1>, vector<1x256xf32>
    %c35_165 = arith.constant 35 : index
    %c0_166 = arith.constant 0 : index
    %178 = vector.load %arg7[%c35_165, %c0_166] : memref<75x256xf32, #tpu.memory_space<vmem>>, vector<1x256xf32>
    tpu.vector_store %arg7[%c35_165, %c0_166], %177 {strides = array<i32>} : memref<75x256xf32, #tpu.memory_space<vmem>>, vector<1x256xf32>,
    %c0_167 = arith.constant 0 : index
    %c1_168 = arith.constant 1 : index
    %c33_169 = arith.constant 33 : index
    %179 = vector.load %arg2[%c0_167, %c1_168, %c33_169] : memref<1x3x324xf32, #tpu.memory_space<vmem>>, vector<1x1x256xf32>
    %180 = vector.shape_cast %179 : vector<1x1x256xf32> to vector<1x256xf32>
    %cst_170 = arith.constant 0.000000e+00 : f32
    %181 = vector.broadcast %cst_170 : f32 to vector<1x256xf32>
    %182 = arith.select %4, %180, %181 : vector<1x256xi1>, vector<1x256xf32>
    %c36_171 = arith.constant 36 : index
    %c0_172 = arith.constant 0 : index
    %183 = vector.load %arg7[%c36_171, %c0_172] : memref<75x256xf32, #tpu.memory_space<vmem>>, vector<1x256xf32>
    tpu.vector_store %arg7[%c36_171, %c0_172], %182 {strides = array<i32>} : memref<75x256xf32, #tpu.memory_space<vmem>>, vector<1x256xf32>,
    %c0_173 = arith.constant 0 : index
    %c1_174 = arith.constant 1 : index
    %c34_175 = arith.constant 34 : index
    %184 = vector.load %arg2[%c0_173, %c1_174, %c34_175] : memref<1x3x324xf32, #tpu.memory_space<vmem>>, vector<1x1x256xf32>
    %185 = vector.shape_cast %184 : vector<1x1x256xf32> to vector<1x256xf32>
    %c37 = arith.constant 37 : index
    %c0_176 = arith.constant 0 : index
    %186 = vector.load %arg7[%c37, %c0_176] : memref<75x256xf32, #tpu.memory_space<vmem>>, vector<1x256xf32>
    tpu.vector_store %arg7[%c37, %c0_176], %185 {strides = array<i32>} : memref<75x256xf32, #tpu.memory_space<vmem>>, vector<1x256xf32>,
    %c0_177 = arith.constant 0 : index
    %c1_178 = arith.constant 1 : index
    %c35_179 = arith.constant 35 : index
    %187 = vector.load %arg2[%c0_177, %c1_178, %c35_179] : memref<1x3x324xf32, #tpu.memory_space<vmem>>, vector<1x1x256xf32>
    %188 = vector.shape_cast %187 : vector<1x1x256xf32> to vector<1x256xf32>
    %cst_180 = arith.constant 0.000000e+00 : f32
    %189 = vector.broadcast %cst_180 : f32 to vector<1x256xf32>
    %190 = arith.select %6, %188, %189 : vector<1x256xi1>, vector<1x256xf32>
    %c38 = arith.constant 38 : index
    %c0_181 = arith.constant 0 : index
    %191 = vector.load %arg7[%c38, %c0_181] : memref<75x256xf32, #tpu.memory_space<vmem>>, vector<1x256xf32>
    tpu.vector_store %arg7[%c38, %c0_181], %190 {strides = array<i32>} : memref<75x256xf32, #tpu.memory_space<vmem>>, vector<1x256xf32>,
    %c0_182 = arith.constant 0 : index
    %c1_183 = arith.constant 1 : index
    %c36_184 = arith.constant 36 : index
    %192 = vector.load %arg2[%c0_182, %c1_183, %c36_184] : memref<1x3x324xf32, #tpu.memory_space<vmem>>, vector<1x1x256xf32>
    %193 = vector.shape_cast %192 : vector<1x1x256xf32> to vector<1x256xf32>
    %cst_185 = arith.constant 0.000000e+00 : f32
    %194 = vector.broadcast %cst_185 : f32 to vector<1x256xf32>
    %195 = arith.select %8, %193, %194 : vector<1x256xi1>, vector<1x256xf32>
    %c39 = arith.constant 39 : index
    %c0_186 = arith.constant 0 : index
    %196 = vector.load %arg7[%c39, %c0_186] : memref<75x256xf32, #tpu.memory_space<vmem>>, vector<1x256xf32>
    tpu.vector_store %arg7[%c39, %c0_186], %195 {strides = array<i32>} : memref<75x256xf32, #tpu.memory_space<vmem>>, vector<1x256xf32>,
    %c0_187 = arith.constant 0 : index
    %c1_188 = arith.constant 1 : index
    %c48_189 = arith.constant 48 : index
    %197 = vector.load %arg2[%c0_187, %c1_188, %c48_189] : memref<1x3x324xf32, #tpu.memory_space<vmem>>, vector<1x1x256xf32>
    %198 = vector.shape_cast %197 : vector<1x1x256xf32> to vector<1x256xf32>
    %cst_190 = arith.constant 0.000000e+00 : f32
    %199 = vector.broadcast %cst_190 : f32 to vector<1x256xf32>
    %200 = arith.select %2, %198, %199 : vector<1x256xi1>, vector<1x256xf32>
    %c40 = arith.constant 40 : index
    %c0_191 = arith.constant 0 : index
    %201 = vector.load %arg7[%c40, %c0_191] : memref<75x256xf32, #tpu.memory_space<vmem>>, vector<1x256xf32>
    tpu.vector_store %arg7[%c40, %c0_191], %200 {strides = array<i32>} : memref<75x256xf32, #tpu.memory_space<vmem>>, vector<1x256xf32>,
    %c0_192 = arith.constant 0 : index
    %c1_193 = arith.constant 1 : index
    %c49_194 = arith.constant 49 : index
    %202 = vector.load %arg2[%c0_192, %c1_193, %c49_194] : memref<1x3x324xf32, #tpu.memory_space<vmem>>, vector<1x1x256xf32>
    %203 = vector.shape_cast %202 : vector<1x1x256xf32> to vector<1x256xf32>
    %cst_195 = arith.constant 0.000000e+00 : f32
    %204 = vector.broadcast %cst_195 : f32 to vector<1x256xf32>
    %205 = arith.select %4, %203, %204 : vector<1x256xi1>, vector<1x256xf32>
    %c41 = arith.constant 41 : index
    %c0_196 = arith.constant 0 : index
    %206 = vector.load %arg7[%c41, %c0_196] : memref<75x256xf32, #tpu.memory_space<vmem>>, vector<1x256xf32>
    tpu.vector_store %arg7[%c41, %c0_196], %205 {strides = array<i32>} : memref<75x256xf32, #tpu.memory_space<vmem>>, vector<1x256xf32>,
    %c0_197 = arith.constant 0 : index
    %c1_198 = arith.constant 1 : index
    %c50_199 = arith.constant 50 : index
    %207 = vector.load %arg2[%c0_197, %c1_198, %c50_199] : memref<1x3x324xf32, #tpu.memory_space<vmem>>, vector<1x1x256xf32>
    %208 = vector.shape_cast %207 : vector<1x1x256xf32> to vector<1x256xf32>
    %c42 = arith.constant 42 : index
    %c0_200 = arith.constant 0 : index
    %209 = vector.load %arg7[%c42, %c0_200] : memref<75x256xf32, #tpu.memory_space<vmem>>, vector<1x256xf32>
    tpu.vector_store %arg7[%c42, %c0_200], %208 {strides = array<i32>} : memref<75x256xf32, #tpu.memory_space<vmem>>, vector<1x256xf32>,
    %c0_201 = arith.constant 0 : index
    %c1_202 = arith.constant 1 : index
    %c51_203 = arith.constant 51 : index
    %210 = vector.load %arg2[%c0_201, %c1_202, %c51_203] : memref<1x3x324xf32, #tpu.memory_space<vmem>>, vector<1x1x256xf32>
    %211 = vector.shape_cast %210 : vector<1x1x256xf32> to vector<1x256xf32>
    %cst_204 = arith.constant 0.000000e+00 : f32
    %212 = vector.broadcast %cst_204 : f32 to vector<1x256xf32>
    %213 = arith.select %6, %211, %212 : vector<1x256xi1>, vector<1x256xf32>
    %c43 = arith.constant 43 : index
    %c0_205 = arith.constant 0 : index
    %214 = vector.load %arg7[%c43, %c0_205] : memref<75x256xf32, #tpu.memory_space<vmem>>, vector<1x256xf32>
    tpu.vector_store %arg7[%c43, %c0_205], %213 {strides = array<i32>} : memref<75x256xf32, #tpu.memory_space<vmem>>, vector<1x256xf32>,
    %c0_206 = arith.constant 0 : index
    %c1_207 = arith.constant 1 : index
    %c52_208 = arith.constant 52 : index
    %215 = vector.load %arg2[%c0_206, %c1_207, %c52_208] : memref<1x3x324xf32, #tpu.memory_space<vmem>>, vector<1x1x256xf32>
    %216 = vector.shape_cast %215 : vector<1x1x256xf32> to vector<1x256xf32>
    %cst_209 = arith.constant 0.000000e+00 : f32
    %217 = vector.broadcast %cst_209 : f32 to vector<1x256xf32>
    %218 = arith.select %8, %216, %217 : vector<1x256xi1>, vector<1x256xf32>
    %c44 = arith.constant 44 : index
    %c0_210 = arith.constant 0 : index
    %219 = vector.load %arg7[%c44, %c0_210] : memref<75x256xf32, #tpu.memory_space<vmem>>, vector<1x256xf32>
    tpu.vector_store %arg7[%c44, %c0_210], %218 {strides = array<i32>} : memref<75x256xf32, #tpu.memory_space<vmem>>, vector<1x256xf32>,
    %c0_211 = arith.constant 0 : index
    %c1_212 = arith.constant 1 : index
    %c64_213 = arith.constant 64 : index
    %220 = vector.load %arg2[%c0_211, %c1_212, %c64_213] : memref<1x3x324xf32, #tpu.memory_space<vmem>>, vector<1x1x256xf32>
    %221 = vector.shape_cast %220 : vector<1x1x256xf32> to vector<1x256xf32>
    %cst_214 = arith.constant 0.000000e+00 : f32
    %222 = vector.broadcast %cst_214 : f32 to vector<1x256xf32>
    %223 = arith.select %2, %221, %222 : vector<1x256xi1>, vector<1x256xf32>
    %c45 = arith.constant 45 : index
    %c0_215 = arith.constant 0 : index
    %224 = vector.load %arg7[%c45, %c0_215] : memref<75x256xf32, #tpu.memory_space<vmem>>, vector<1x256xf32>
    tpu.vector_store %arg7[%c45, %c0_215], %223 {strides = array<i32>} : memref<75x256xf32, #tpu.memory_space<vmem>>, vector<1x256xf32>,
    %c0_216 = arith.constant 0 : index
    %c1_217 = arith.constant 1 : index
    %c65_218 = arith.constant 65 : index
    %225 = vector.load %arg2[%c0_216, %c1_217, %c65_218] : memref<1x3x324xf32, #tpu.memory_space<vmem>>, vector<1x1x256xf32>
    %226 = vector.shape_cast %225 : vector<1x1x256xf32> to vector<1x256xf32>
    %cst_219 = arith.constant 0.000000e+00 : f32
    %227 = vector.broadcast %cst_219 : f32 to vector<1x256xf32>
    %228 = arith.select %4, %226, %227 : vector<1x256xi1>, vector<1x256xf32>
    %c46 = arith.constant 46 : index
    %c0_220 = arith.constant 0 : index
    %229 = vector.load %arg7[%c46, %c0_220] : memref<75x256xf32, #tpu.memory_space<vmem>>, vector<1x256xf32>
    tpu.vector_store %arg7[%c46, %c0_220], %228 {strides = array<i32>} : memref<75x256xf32, #tpu.memory_space<vmem>>, vector<1x256xf32>,
    %c0_221 = arith.constant 0 : index
    %c1_222 = arith.constant 1 : index
    %c66_223 = arith.constant 66 : index
    %230 = vector.load %arg2[%c0_221, %c1_222, %c66_223] : memref<1x3x324xf32, #tpu.memory_space<vmem>>, vector<1x1x256xf32>
    %231 = vector.shape_cast %230 : vector<1x1x256xf32> to vector<1x256xf32>
    %c47 = arith.constant 47 : index
    %c0_224 = arith.constant 0 : index
    %232 = vector.load %arg7[%c47, %c0_224] : memref<75x256xf32, #tpu.memory_space<vmem>>, vector<1x256xf32>
    tpu.vector_store %arg7[%c47, %c0_224], %231 {strides = array<i32>} : memref<75x256xf32, #tpu.memory_space<vmem>>, vector<1x256xf32>,
    %c0_225 = arith.constant 0 : index
    %c1_226 = arith.constant 1 : index
    %c67_227 = arith.constant 67 : index
    %233 = vector.load %arg2[%c0_225, %c1_226, %c67_227] : memref<1x3x324xf32, #tpu.memory_space<vmem>>, vector<1x1x256xf32>
    %234 = vector.shape_cast %233 : vector<1x1x256xf32> to vector<1x256xf32>
    %cst_228 = arith.constant 0.000000e+00 : f32
    %235 = vector.broadcast %cst_228 : f32 to vector<1x256xf32>
    %236 = arith.select %6, %234, %235 : vector<1x256xi1>, vector<1x256xf32>
    %c48_229 = arith.constant 48 : index
    %c0_230 = arith.constant 0 : index
    %237 = vector.load %arg7[%c48_229, %c0_230] : memref<75x256xf32, #tpu.memory_space<vmem>>, vector<1x256xf32>
    tpu.vector_store %arg7[%c48_229, %c0_230], %236 {strides = array<i32>} : memref<75x256xf32, #tpu.memory_space<vmem>>, vector<1x256xf32>,
    %c0_231 = arith.constant 0 : index
    %c1_232 = arith.constant 1 : index
    %c68_233 = arith.constant 68 : index
    %238 = vector.load %arg2[%c0_231, %c1_232, %c68_233] : memref<1x3x324xf32, #tpu.memory_space<vmem>>, vector<1x1x256xf32>
    %239 = vector.shape_cast %238 : vector<1x1x256xf32> to vector<1x256xf32>
    %cst_234 = arith.constant 0.000000e+00 : f32
    %240 = vector.broadcast %cst_234 : f32 to vector<1x256xf32>
    %241 = arith.select %8, %239, %240 : vector<1x256xi1>, vector<1x256xf32>
    %c49_235 = arith.constant 49 : index
    %c0_236 = arith.constant 0 : index
    %242 = vector.load %arg7[%c49_235, %c0_236] : memref<75x256xf32, #tpu.memory_space<vmem>>, vector<1x256xf32>
    tpu.vector_store %arg7[%c49_235, %c0_236], %241 {strides = array<i32>} : memref<75x256xf32, #tpu.memory_space<vmem>>, vector<1x256xf32>,
    %c0_237 = arith.constant 0 : index
    %c2_238 = arith.constant 2 : index
    %c0_239 = arith.constant 0 : index
    %243 = vector.load %arg2[%c0_237, %c2_238, %c0_239] : memref<1x3x324xf32, #tpu.memory_space<vmem>>, vector<1x1x256xf32>
    %244 = vector.shape_cast %243 : vector<1x1x256xf32> to vector<1x256xf32>
    %cst_240 = arith.constant 0.000000e+00 : f32
    %245 = vector.broadcast %cst_240 : f32 to vector<1x256xf32>
    %246 = arith.select %2, %244, %245 : vector<1x256xi1>, vector<1x256xf32>
    %c50_241 = arith.constant 50 : index
    %c0_242 = arith.constant 0 : index
    %247 = vector.load %arg7[%c50_241, %c0_242] : memref<75x256xf32, #tpu.memory_space<vmem>>, vector<1x256xf32>
    tpu.vector_store %arg7[%c50_241, %c0_242], %246 {strides = array<i32>} : memref<75x256xf32, #tpu.memory_space<vmem>>, vector<1x256xf32>,
    %c0_243 = arith.constant 0 : index
    %c2_244 = arith.constant 2 : index
    %c1_245 = arith.constant 1 : index
    %248 = vector.load %arg2[%c0_243, %c2_244, %c1_245] : memref<1x3x324xf32, #tpu.memory_space<vmem>>, vector<1x1x256xf32>
    %249 = vector.shape_cast %248 : vector<1x1x256xf32> to vector<1x256xf32>
    %cst_246 = arith.constant 0.000000e+00 : f32
    %250 = vector.broadcast %cst_246 : f32 to vector<1x256xf32>
    %251 = arith.select %4, %249, %250 : vector<1x256xi1>, vector<1x256xf32>
    %c51_247 = arith.constant 51 : index
    %c0_248 = arith.constant 0 : index
    %252 = vector.load %arg7[%c51_247, %c0_248] : memref<75x256xf32, #tpu.memory_space<vmem>>, vector<1x256xf32>
    tpu.vector_store %arg7[%c51_247, %c0_248], %251 {strides = array<i32>} : memref<75x256xf32, #tpu.memory_space<vmem>>, vector<1x256xf32>,
    %c0_249 = arith.constant 0 : index
    %c2_250 = arith.constant 2 : index
    %c2_251 = arith.constant 2 : index
    %253 = vector.load %arg2[%c0_249, %c2_250, %c2_251] : memref<1x3x324xf32, #tpu.memory_space<vmem>>, vector<1x1x256xf32>
    %254 = vector.shape_cast %253 : vector<1x1x256xf32> to vector<1x256xf32>
    %c52_252 = arith.constant 52 : index
    %c0_253 = arith.constant 0 : index
    %255 = vector.load %arg7[%c52_252, %c0_253] : memref<75x256xf32, #tpu.memory_space<vmem>>, vector<1x256xf32>
    tpu.vector_store %arg7[%c52_252, %c0_253], %254 {strides = array<i32>} : memref<75x256xf32, #tpu.memory_space<vmem>>, vector<1x256xf32>,
    %c0_254 = arith.constant 0 : index
    %c2_255 = arith.constant 2 : index
    %c3_256 = arith.constant 3 : index
    %256 = vector.load %arg2[%c0_254, %c2_255, %c3_256] : memref<1x3x324xf32, #tpu.memory_space<vmem>>, vector<1x1x256xf32>
    %257 = vector.shape_cast %256 : vector<1x1x256xf32> to vector<1x256xf32>
    %cst_257 = arith.constant 0.000000e+00 : f32
    %258 = vector.broadcast %cst_257 : f32 to vector<1x256xf32>
    %259 = arith.select %6, %257, %258 : vector<1x256xi1>, vector<1x256xf32>
    %c53 = arith.constant 53 : index
    %c0_258 = arith.constant 0 : index
    %260 = vector.load %arg7[%c53, %c0_258] : memref<75x256xf32, #tpu.memory_space<vmem>>, vector<1x256xf32>
    tpu.vector_store %arg7[%c53, %c0_258], %259 {strides = array<i32>} : memref<75x256xf32, #tpu.memory_space<vmem>>, vector<1x256xf32>,
    %c0_259 = arith.constant 0 : index
    %c2_260 = arith.constant 2 : index
    %c4_261 = arith.constant 4 : index
    %261 = vector.load %arg2[%c0_259, %c2_260, %c4_261] : memref<1x3x324xf32, #tpu.memory_space<vmem>>, vector<1x1x256xf32>
    %262 = vector.shape_cast %261 : vector<1x1x256xf32> to vector<1x256xf32>
    %cst_262 = arith.constant 0.000000e+00 : f32
    %263 = vector.broadcast %cst_262 : f32 to vector<1x256xf32>
    %264 = arith.select %8, %262, %263 : vector<1x256xi1>, vector<1x256xf32>
    %c54 = arith.constant 54 : index
    %c0_263 = arith.constant 0 : index
    %265 = vector.load %arg7[%c54, %c0_263] : memref<75x256xf32, #tpu.memory_space<vmem>>, vector<1x256xf32>
    tpu.vector_store %arg7[%c54, %c0_263], %264 {strides = array<i32>} : memref<75x256xf32, #tpu.memory_space<vmem>>, vector<1x256xf32>,
    %c0_264 = arith.constant 0 : index
    %c2_265 = arith.constant 2 : index
    %c16_266 = arith.constant 16 : index
    %266 = vector.load %arg2[%c0_264, %c2_265, %c16_266] : memref<1x3x324xf32, #tpu.memory_space<vmem>>, vector<1x1x256xf32>
    %267 = vector.shape_cast %266 : vector<1x1x256xf32> to vector<1x256xf32>
    %cst_267 = arith.constant 0.000000e+00 : f32
    %268 = vector.broadcast %cst_267 : f32 to vector<1x256xf32>
    %269 = arith.select %2, %267, %268 : vector<1x256xi1>, vector<1x256xf32>
    %c55 = arith.constant 55 : index
    %c0_268 = arith.constant 0 : index
    %270 = vector.load %arg7[%c55, %c0_268] : memref<75x256xf32, #tpu.memory_space<vmem>>, vector<1x256xf32>
    tpu.vector_store %arg7[%c55, %c0_268], %269 {strides = array<i32>} : memref<75x256xf32, #tpu.memory_space<vmem>>, vector<1x256xf32>,
    %c0_269 = arith.constant 0 : index
    %c2_270 = arith.constant 2 : index
    %c17_271 = arith.constant 17 : index
    %271 = vector.load %arg2[%c0_269, %c2_270, %c17_271] : memref<1x3x324xf32, #tpu.memory_space<vmem>>, vector<1x1x256xf32>
    %272 = vector.shape_cast %271 : vector<1x1x256xf32> to vector<1x256xf32>
    %cst_272 = arith.constant 0.000000e+00 : f32
    %273 = vector.broadcast %cst_272 : f32 to vector<1x256xf32>
    %274 = arith.select %4, %272, %273 : vector<1x256xi1>, vector<1x256xf32>
    %c56 = arith.constant 56 : index
    %c0_273 = arith.constant 0 : index
    %275 = vector.load %arg7[%c56, %c0_273] : memref<75x256xf32, #tpu.memory_space<vmem>>, vector<1x256xf32>
    tpu.vector_store %arg7[%c56, %c0_273], %274 {strides = array<i32>} : memref<75x256xf32, #tpu.memory_space<vmem>>, vector<1x256xf32>,
    %c0_274 = arith.constant 0 : index
    %c2_275 = arith.constant 2 : index
    %c18_276 = arith.constant 18 : index
    %276 = vector.load %arg2[%c0_274, %c2_275, %c18_276] : memref<1x3x324xf32, #tpu.memory_space<vmem>>, vector<1x1x256xf32>
    %277 = vector.shape_cast %276 : vector<1x1x256xf32> to vector<1x256xf32>
    %c57 = arith.constant 57 : index
    %c0_277 = arith.constant 0 : index
    %278 = vector.load %arg7[%c57, %c0_277] : memref<75x256xf32, #tpu.memory_space<vmem>>, vector<1x256xf32>
    tpu.vector_store %arg7[%c57, %c0_277], %277 {strides = array<i32>} : memref<75x256xf32, #tpu.memory_space<vmem>>, vector<1x256xf32>,
    %c0_278 = arith.constant 0 : index
    %c2_279 = arith.constant 2 : index
    %c19_280 = arith.constant 19 : index
    %279 = vector.load %arg2[%c0_278, %c2_279, %c19_280] : memref<1x3x324xf32, #tpu.memory_space<vmem>>, vector<1x1x256xf32>
    %280 = vector.shape_cast %279 : vector<1x1x256xf32> to vector<1x256xf32>
    %cst_281 = arith.constant 0.000000e+00 : f32
    %281 = vector.broadcast %cst_281 : f32 to vector<1x256xf32>
    %282 = arith.select %6, %280, %281 : vector<1x256xi1>, vector<1x256xf32>
    %c58 = arith.constant 58 : index
    %c0_282 = arith.constant 0 : index
    %283 = vector.load %arg7[%c58, %c0_282] : memref<75x256xf32, #tpu.memory_space<vmem>>, vector<1x256xf32>
    tpu.vector_store %arg7[%c58, %c0_282], %282 {strides = array<i32>} : memref<75x256xf32, #tpu.memory_space<vmem>>, vector<1x256xf32>,
    %c0_283 = arith.constant 0 : index
    %c2_284 = arith.constant 2 : index
    %c20_285 = arith.constant 20 : index
    %284 = vector.load %arg2[%c0_283, %c2_284, %c20_285] : memref<1x3x324xf32, #tpu.memory_space<vmem>>, vector<1x1x256xf32>
    %285 = vector.shape_cast %284 : vector<1x1x256xf32> to vector<1x256xf32>
    %cst_286 = arith.constant 0.000000e+00 : f32
    %286 = vector.broadcast %cst_286 : f32 to vector<1x256xf32>
    %287 = arith.select %8, %285, %286 : vector<1x256xi1>, vector<1x256xf32>
    %c59 = arith.constant 59 : index
    %c0_287 = arith.constant 0 : index
    %288 = vector.load %arg7[%c59, %c0_287] : memref<75x256xf32, #tpu.memory_space<vmem>>, vector<1x256xf32>
    tpu.vector_store %arg7[%c59, %c0_287], %287 {strides = array<i32>} : memref<75x256xf32, #tpu.memory_space<vmem>>, vector<1x256xf32>,
    %c0_288 = arith.constant 0 : index
    %c2_289 = arith.constant 2 : index
    %c32_290 = arith.constant 32 : index
    %289 = vector.load %arg2[%c0_288, %c2_289, %c32_290] : memref<1x3x324xf32, #tpu.memory_space<vmem>>, vector<1x1x256xf32>
    %290 = vector.shape_cast %289 : vector<1x1x256xf32> to vector<1x256xf32>
    %cst_291 = arith.constant 0.000000e+00 : f32
    %291 = vector.broadcast %cst_291 : f32 to vector<1x256xf32>
    %292 = arith.select %2, %290, %291 : vector<1x256xi1>, vector<1x256xf32>
    %c60 = arith.constant 60 : index
    %c0_292 = arith.constant 0 : index
    %293 = vector.load %arg7[%c60, %c0_292] : memref<75x256xf32, #tpu.memory_space<vmem>>, vector<1x256xf32>
    tpu.vector_store %arg7[%c60, %c0_292], %292 {strides = array<i32>} : memref<75x256xf32, #tpu.memory_space<vmem>>, vector<1x256xf32>,
    %c0_293 = arith.constant 0 : index
    %c2_294 = arith.constant 2 : index
    %c33_295 = arith.constant 33 : index
    %294 = vector.load %arg2[%c0_293, %c2_294, %c33_295] : memref<1x3x324xf32, #tpu.memory_space<vmem>>, vector<1x1x256xf32>
    %295 = vector.shape_cast %294 : vector<1x1x256xf32> to vector<1x256xf32>
    %cst_296 = arith.constant 0.000000e+00 : f32
    %296 = vector.broadcast %cst_296 : f32 to vector<1x256xf32>
    %297 = arith.select %4, %295, %296 : vector<1x256xi1>, vector<1x256xf32>
    %c61 = arith.constant 61 : index
    %c0_297 = arith.constant 0 : index
    %298 = vector.load %arg7[%c61, %c0_297] : memref<75x256xf32, #tpu.memory_space<vmem>>, vector<1x256xf32>
    tpu.vector_store %arg7[%c61, %c0_297], %297 {strides = array<i32>} : memref<75x256xf32, #tpu.memory_space<vmem>>, vector<1x256xf32>,
    %c0_298 = arith.constant 0 : index
    %c2_299 = arith.constant 2 : index
    %c34_300 = arith.constant 34 : index
    %299 = vector.load %arg2[%c0_298, %c2_299, %c34_300] : memref<1x3x324xf32, #tpu.memory_space<vmem>>, vector<1x1x256xf32>
    %300 = vector.shape_cast %299 : vector<1x1x256xf32> to vector<1x256xf32>
    %c62 = arith.constant 62 : index
    %c0_301 = arith.constant 0 : index
    %301 = vector.load %arg7[%c62, %c0_301] : memref<75x256xf32, #tpu.memory_space<vmem>>, vector<1x256xf32>
    tpu.vector_store %arg7[%c62, %c0_301], %300 {strides = array<i32>} : memref<75x256xf32, #tpu.memory_space<vmem>>, vector<1x256xf32>,
    %c0_302 = arith.constant 0 : index
    %c2_303 = arith.constant 2 : index
    %c35_304 = arith.constant 35 : index
    %302 = vector.load %arg2[%c0_302, %c2_303, %c35_304] : memref<1x3x324xf32, #tpu.memory_space<vmem>>, vector<1x1x256xf32>
    %303 = vector.shape_cast %302 : vector<1x1x256xf32> to vector<1x256xf32>
    %cst_305 = arith.constant 0.000000e+00 : f32
    %304 = vector.broadcast %cst_305 : f32 to vector<1x256xf32>
    %305 = arith.select %6, %303, %304 : vector<1x256xi1>, vector<1x256xf32>
    %c63 = arith.constant 63 : index
    %c0_306 = arith.constant 0 : index
    %306 = vector.load %arg7[%c63, %c0_306] : memref<75x256xf32, #tpu.memory_space<vmem>>, vector<1x256xf32>
    tpu.vector_store %arg7[%c63, %c0_306], %305 {strides = array<i32>} : memref<75x256xf32, #tpu.memory_space<vmem>>, vector<1x256xf32>,
    %c0_307 = arith.constant 0 : index
    %c2_308 = arith.constant 2 : index
    %c36_309 = arith.constant 36 : index
    %307 = vector.load %arg2[%c0_307, %c2_308, %c36_309] : memref<1x3x324xf32, #tpu.memory_space<vmem>>, vector<1x1x256xf32>
    %308 = vector.shape_cast %307 : vector<1x1x256xf32> to vector<1x256xf32>
    %cst_310 = arith.constant 0.000000e+00 : f32
    %309 = vector.broadcast %cst_310 : f32 to vector<1x256xf32>
    %310 = arith.select %8, %308, %309 : vector<1x256xi1>, vector<1x256xf32>
    %c64_311 = arith.constant 64 : index
    %c0_312 = arith.constant 0 : index
    %311 = vector.load %arg7[%c64_311, %c0_312] : memref<75x256xf32, #tpu.memory_space<vmem>>, vector<1x256xf32>
    tpu.vector_store %arg7[%c64_311, %c0_312], %310 {strides = array<i32>} : memref<75x256xf32, #tpu.memory_space<vmem>>, vector<1x256xf32>,
    %c0_313 = arith.constant 0 : index
    %c2_314 = arith.constant 2 : index
    %c48_315 = arith.constant 48 : index
    %312 = vector.load %arg2[%c0_313, %c2_314, %c48_315] : memref<1x3x324xf32, #tpu.memory_space<vmem>>, vector<1x1x256xf32>
    %313 = vector.shape_cast %312 : vector<1x1x256xf32> to vector<1x256xf32>
    %cst_316 = arith.constant 0.000000e+00 : f32
    %314 = vector.broadcast %cst_316 : f32 to vector<1x256xf32>
    %315 = arith.select %2, %313, %314 : vector<1x256xi1>, vector<1x256xf32>
    %c65_317 = arith.constant 65 : index
    %c0_318 = arith.constant 0 : index
    %316 = vector.load %arg7[%c65_317, %c0_318] : memref<75x256xf32, #tpu.memory_space<vmem>>, vector<1x256xf32>
    tpu.vector_store %arg7[%c65_317, %c0_318], %315 {strides = array<i32>} : memref<75x256xf32, #tpu.memory_space<vmem>>, vector<1x256xf32>,
    %c0_319 = arith.constant 0 : index
    %c2_320 = arith.constant 2 : index
    %c49_321 = arith.constant 49 : index
    %317 = vector.load %arg2[%c0_319, %c2_320, %c49_321] : memref<1x3x324xf32, #tpu.memory_space<vmem>>, vector<1x1x256xf32>
    %318 = vector.shape_cast %317 : vector<1x1x256xf32> to vector<1x256xf32>
    %cst_322 = arith.constant 0.000000e+00 : f32
    %319 = vector.broadcast %cst_322 : f32 to vector<1x256xf32>
    %320 = arith.select %4, %318, %319 : vector<1x256xi1>, vector<1x256xf32>
    %c66_323 = arith.constant 66 : index
    %c0_324 = arith.constant 0 : index
    %321 = vector.load %arg7[%c66_323, %c0_324] : memref<75x256xf32, #tpu.memory_space<vmem>>, vector<1x256xf32>
    tpu.vector_store %arg7[%c66_323, %c0_324], %320 {strides = array<i32>} : memref<75x256xf32, #tpu.memory_space<vmem>>, vector<1x256xf32>,
    %c0_325 = arith.constant 0 : index
    %c2_326 = arith.constant 2 : index
    %c50_327 = arith.constant 50 : index
    %322 = vector.load %arg2[%c0_325, %c2_326, %c50_327] : memref<1x3x324xf32, #tpu.memory_space<vmem>>, vector<1x1x256xf32>
    %323 = vector.shape_cast %322 : vector<1x1x256xf32> to vector<1x256xf32>
    %c67_328 = arith.constant 67 : index
    %c0_329 = arith.constant 0 : index
    %324 = vector.load %arg7[%c67_328, %c0_329] : memref<75x256xf32, #tpu.memory_space<vmem>>, vector<1x256xf32>
    tpu.vector_store %arg7[%c67_328, %c0_329], %323 {strides = array<i32>} : memref<75x256xf32, #tpu.memory_space<vmem>>, vector<1x256xf32>,
    %c0_330 = arith.constant 0 : index
    %c2_331 = arith.constant 2 : index
    %c51_332 = arith.constant 51 : index
    %325 = vector.load %arg2[%c0_330, %c2_331, %c51_332] : memref<1x3x324xf32, #tpu.memory_space<vmem>>, vector<1x1x256xf32>
    %326 = vector.shape_cast %325 : vector<1x1x256xf32> to vector<1x256xf32>
    %cst_333 = arith.constant 0.000000e+00 : f32
    %327 = vector.broadcast %cst_333 : f32 to vector<1x256xf32>
    %328 = arith.select %6, %326, %327 : vector<1x256xi1>, vector<1x256xf32>
    %c68_334 = arith.constant 68 : index
    %c0_335 = arith.constant 0 : index
    %329 = vector.load %arg7[%c68_334, %c0_335] : memref<75x256xf32, #tpu.memory_space<vmem>>, vector<1x256xf32>
    tpu.vector_store %arg7[%c68_334, %c0_335], %328 {strides = array<i32>} : memref<75x256xf32, #tpu.memory_space<vmem>>, vector<1x256xf32>,
    %c0_336 = arith.constant 0 : index
    %c2_337 = arith.constant 2 : index
    %c52_338 = arith.constant 52 : index
    %330 = vector.load %arg2[%c0_336, %c2_337, %c52_338] : memref<1x3x324xf32, #tpu.memory_space<vmem>>, vector<1x1x256xf32>
    %331 = vector.shape_cast %330 : vector<1x1x256xf32> to vector<1x256xf32>
    %cst_339 = arith.constant 0.000000e+00 : f32
    %332 = vector.broadcast %cst_339 : f32 to vector<1x256xf32>
    %333 = arith.select %8, %331, %332 : vector<1x256xi1>, vector<1x256xf32>
    %c69 = arith.constant 69 : index
    %c0_340 = arith.constant 0 : index
    %334 = vector.load %arg7[%c69, %c0_340] : memref<75x256xf32, #tpu.memory_space<vmem>>, vector<1x256xf32>
    tpu.vector_store %arg7[%c69, %c0_340], %333 {strides = array<i32>} : memref<75x256xf32, #tpu.memory_space<vmem>>, vector<1x256xf32>,
    %c0_341 = arith.constant 0 : index
    %c2_342 = arith.constant 2 : index
    %c64_343 = arith.constant 64 : index
    %335 = vector.load %arg2[%c0_341, %c2_342, %c64_343] : memref<1x3x324xf32, #tpu.memory_space<vmem>>, vector<1x1x256xf32>
    %336 = vector.shape_cast %335 : vector<1x1x256xf32> to vector<1x256xf32>
    %cst_344 = arith.constant 0.000000e+00 : f32
    %337 = vector.broadcast %cst_344 : f32 to vector<1x256xf32>
    %338 = arith.select %2, %336, %337 : vector<1x256xi1>, vector<1x256xf32>
    %c70 = arith.constant 70 : index
    %c0_345 = arith.constant 0 : index
    %339 = vector.load %arg7[%c70, %c0_345] : memref<75x256xf32, #tpu.memory_space<vmem>>, vector<1x256xf32>
    tpu.vector_store %arg7[%c70, %c0_345], %338 {strides = array<i32>} : memref<75x256xf32, #tpu.memory_space<vmem>>, vector<1x256xf32>,
    %c0_346 = arith.constant 0 : index
    %c2_347 = arith.constant 2 : index
    %c65_348 = arith.constant 65 : index
    %340 = vector.load %arg2[%c0_346, %c2_347, %c65_348] : memref<1x3x324xf32, #tpu.memory_space<vmem>>, vector<1x1x256xf32>
    %341 = vector.shape_cast %340 : vector<1x1x256xf32> to vector<1x256xf32>
    %cst_349 = arith.constant 0.000000e+00 : f32
    %342 = vector.broadcast %cst_349 : f32 to vector<1x256xf32>
    %343 = arith.select %4, %341, %342 : vector<1x256xi1>, vector<1x256xf32>
    %c71 = arith.constant 71 : index
    %c0_350 = arith.constant 0 : index
    %344 = vector.load %arg7[%c71, %c0_350] : memref<75x256xf32, #tpu.memory_space<vmem>>, vector<1x256xf32>
    tpu.vector_store %arg7[%c71, %c0_350], %343 {strides = array<i32>} : memref<75x256xf32, #tpu.memory_space<vmem>>, vector<1x256xf32>,
    %c0_351 = arith.constant 0 : index
    %c2_352 = arith.constant 2 : index
    %c66_353 = arith.constant 66 : index
    %345 = vector.load %arg2[%c0_351, %c2_352, %c66_353] : memref<1x3x324xf32, #tpu.memory_space<vmem>>, vector<1x1x256xf32>
    %346 = vector.shape_cast %345 : vector<1x1x256xf32> to vector<1x256xf32>
    %c72 = arith.constant 72 : index
    %c0_354 = arith.constant 0 : index
    %347 = vector.load %arg7[%c72, %c0_354] : memref<75x256xf32, #tpu.memory_space<vmem>>, vector<1x256xf32>
    tpu.vector_store %arg7[%c72, %c0_354], %346 {strides = array<i32>} : memref<75x256xf32, #tpu.memory_space<vmem>>, vector<1x256xf32>,
    %c0_355 = arith.constant 0 : index
    %c2_356 = arith.constant 2 : index
    %c67_357 = arith.constant 67 : index
    %348 = vector.load %arg2[%c0_355, %c2_356, %c67_357] : memref<1x3x324xf32, #tpu.memory_space<vmem>>, vector<1x1x256xf32>
    %349 = vector.shape_cast %348 : vector<1x1x256xf32> to vector<1x256xf32>
    %cst_358 = arith.constant 0.000000e+00 : f32
    %350 = vector.broadcast %cst_358 : f32 to vector<1x256xf32>
    %351 = arith.select %6, %349, %350 : vector<1x256xi1>, vector<1x256xf32>
    %c73 = arith.constant 73 : index
    %c0_359 = arith.constant 0 : index
    %352 = vector.load %arg7[%c73, %c0_359] : memref<75x256xf32, #tpu.memory_space<vmem>>, vector<1x256xf32>
    tpu.vector_store %arg7[%c73, %c0_359], %351 {strides = array<i32>} : memref<75x256xf32, #tpu.memory_space<vmem>>, vector<1x256xf32>,
    %c0_360 = arith.constant 0 : index
    %c2_361 = arith.constant 2 : index
    %c68_362 = arith.constant 68 : index
    %353 = vector.load %arg2[%c0_360, %c2_361, %c68_362] : memref<1x3x324xf32, #tpu.memory_space<vmem>>, vector<1x1x256xf32>
    %354 = vector.shape_cast %353 : vector<1x1x256xf32> to vector<1x256xf32>
    %cst_363 = arith.constant 0.000000e+00 : f32
    %355 = vector.broadcast %cst_363 : f32 to vector<1x256xf32>
    %356 = arith.select %8, %354, %355 : vector<1x256xi1>, vector<1x256xf32>
    %c74 = arith.constant 74 : index
    %c0_364 = arith.constant 0 : index
    %357 = vector.load %arg7[%c74, %c0_364] : memref<75x256xf32, #tpu.memory_space<vmem>>, vector<1x256xf32>
    tpu.vector_store %arg7[%c74, %c0_364], %356 {strides = array<i32>} : memref<75x256xf32, #tpu.memory_space<vmem>>, vector<1x256xf32>,
    %c0_365 = arith.constant 0 : index
    %c0_366 = arith.constant 0 : index
    %358 = vector.load %arg7[%c0_365, %c0_366] : memref<75x256xf32, #tpu.memory_space<vmem>>, vector<75x256xf32>
    %cst_367 = arith.constant dense<0.000000e+00> : vector<32x256xf32>
    %359 = tpu.matmul %9, %358, %cst_367 {dimension_numbers = #tpu.dot_dimension_numbers<[1], [0], [0], [1], [0, 0, 1, 1], [], []>} : vector<32x75xf32>, vector<75x256xf32>, vector<32x256xf32> -> vector<32x256xf32>
    %360 = arith.addf %359, %12 : vector<32x256xf32>
    %c0_368 = arith.constant 0 : index
    %c0_369 = arith.constant 0 : index
    %c0_370 = arith.constant 0 : index
    %361 = vector.load %arg6[%c0_368, %c0_369, %c0_370] : memref<1x32x256xf32, #tpu.memory_space<vmem>>, vector<1x32x256xf32>
    %362 = vector.shape_cast %361 : vector<1x32x256xf32> to vector<32x256xf32>
    %363 = vector.shape_cast %360 : vector<32x256xf32> to vector<1x32x256xf32>
    tpu.vector_store %arg6[%c0_368, %c0_369, %c0_370], %363 {strides = array<i32>} : memref<1x32x256xf32, #tpu.memory_space<vmem>>, vector<1x32x256xf32>,
    return
  }
  func.func @transform_0(%arg0: i32, %arg1: i32) -> (i32, i32, i32) {
    %c0_i32 = arith.constant 0 : i32
    %c0_i32_0 = arith.constant 0 : i32
    %c0_i32_1 = arith.constant 0 : i32
    return %arg0, %c0_i32, %c0_i32_0 : i32, i32, i32
  }
  func.func @transform_1(%arg0: i32, %arg1: i32) -> (i32, i32) {
    %c0_i32 = arith.constant 0 : i32
    %c0_i32_0 = arith.constant 0 : i32
    %c0_i32_1 = arith.constant 0 : i32
    return %c0_i32, %c0_i32_0 : i32, i32
  }
  func.func @transform_2(%arg0: i32, %arg1: i32) -> (i32, i32) {
    %c0_i32 = arith.constant 0 : i32
    %c0_i32_0 = arith.constant 0 : i32
    %c0_i32_1 = arith.constant 0 : i32
    return %c0_i32, %c0_i32_0 : i32, i32
  }
  func.func @transform_3(%arg0: i32, %arg1: i32) -> (i32, i32) {
    %c0_i32 = arith.constant 0 : i32
    %c0_i32_0 = arith.constant 0 : i32
    return %c0_i32, %arg1 : i32, i32
  }
  func.func @transform_4(%arg0: i32, %arg1: i32) -> (i32, i32, i32) {
    %c0_i32 = arith.constant 0 : i32
    %c0_i32_0 = arith.constant 0 : i32
    return %arg0, %c0_i32, %arg1 : i32, i32, i32
  }
}

</mosaic_0001>

<bundles_post_ra>
// kernel: firstconvlayer_forward.1
= control target key start
LH: loop header
LB: loop body
LE: loop exit
PB: predicated region body
PF: predicated region fallthrough
CT: control target
= control target key end

     0   :  { %s1540_s15 = smov 0   ;;  %s1542_s16 = smov 0   ;;  %s2113_s0 = inlined_call_operand.vmem [shape: f32[2,3,324], index: 0, kind: input, shape index: {}]   ;;  %s2114_s1 = inlined_call_operand.vmem [shape: f32[32,75], index: 1, kind: input, shape index: {}]   ;;  %s2115_s2 = inlined_call_operand.vmem [shape: f32[32,1], index: 2, kind: input, shape index: {}]   ;;  %s2116_s3 = inlined_call_operand.vmem [shape: s32[1,256], index: 3, kind: input, shape index: {}]   ;;  %s2117_s4 = inlined_call_operand.vmem [shape: f32[2,32,256], index: 4, kind: output, shape index: {}]  }
   0x1   :  { %s1544_s17 = smov 0  }
   0x2 LB: > { %s26_s18 = sadd.s32 1, %s1483_s16  ;;  %p1329_p0 = scmp.ge.s32.totalorder %s1487_s17, 1  ;;  %s1487_s17 = sphi %s1544_s17, %s14_s17   ;;  %s1483_s16 = sphi %s1542_s16, %s2177_s16   ;;  %s1479_s15 = sphi %s1540_s15, %s2176_s15  }
   0x3   : > { %p28_p1 = scmp.ge.s32.totalorder %s26_s18, 2  ;;  %p186_p2 = scmp.lt.s32.totalorder %s1487_s17, 3 }
   0x5   : > { %s2179_s18 = smov (%p28_p1, %s26_s18), 0  ;;  %p187_p3 = pnand %p1329_p0, %p186_p2 }
   0x6   : > { %p220_p4 = scmp.lt.s32.totalorder (!%p187_p3), %s1479_s15, 1  ;;  %s2120_s23 = smov (!%p187_p3), 61  }
   0x7   : > { %190 = sbr.rel (%p187_p3) target bundleno = 489 (0x1e9), region = 36  ;;  %s1490_s24 = smov (!%p187_p3), 62  }
   0x8   : > { %s2121_s25 = smov (!%p187_p3), 60   ;;  %s1492_s26 = smov (!%p187_p3), 92  }
   0x9   : > { %s2122_s27 = smov (!%p187_p3), 80   ;;  %s1494_s28 = smov (!%p187_p3), 79  }
   0xa   : > { %s1495_s29 = smov (!%p187_p3), 77   ;;  %s1496_s30 = smov (!%p187_p3), 76  }
   0xb   : > { %s1497_s5 = smov (!%p187_p3), 64   ;;  %s1498_s6 = smov (!%p187_p3), 63  }
   0xc   : > { %s2181_s15 = smov (!%p220_p4, %s1479_s15), 1  ;;  %s1499_s7 = smov 78   ;;  %v275_v22 = vlaneseq  ;;  %v1611_v23 = vld [vmem:[%s2116_s3] sm:$0x3]  ;;  %vm2133_vm2 = vcmask 498688   ;;  %vm2125_vm3 = vcmask 506880  }
   0xd   : > { %s1412_s19 = smul.u32 12, %s2181_s15  ;;  %s2118_s8 = smov 111   ;;  %vm241_vm0 = vcmp.ge.s32.totalorder %v1611_v23, 2  ;;  %vm243_vm4 = vcmp.le.s32.totalorder %v1611_v23, 14  ;;  %vm2135_vm5 = vcmask 490496   ;;  %vm2124_vm6 = vcmask 752640  }
   0xe   : > { %s1501_s9 = smov 109   ;;  %s1502_s10 = smov 108   ;;  %vm1619_vm1 = vcmp.lt.s32.totalorder %v275_v22, 256  ;;  %vm244_vm7 = vcmp.le.s32.totalorder %v1611_v23, 13  ;;  %vm2137_vm8 = vcmask 654336   ;;  %vm463_vm9 = vcmask 646144  }
   0xf   : > { %s1564_s22 = scalar_lea.vmem %s2113_s0, %s1412_s19  ;;  %s1503_s11 = smov 96   ;;  %vm242_vm10 = vcmp.ge.s32.totalorder %v1611_v23, 1  ;;  %vm2140_vm11 = vcmask 629760   ;;  %vm2138_vm12 = vcmask 621568   ;;  %vm2126_vm13 = vcmask 523264   ;;  %v245_v23 = vld [vmem:[%s2114_s1] sm:$0xff] }
  0x10   : > { %v1381_v0 = vld [vmem:[%s1564_s22 + $0x2] ss:$4 sm:$0x7]  ;;  %s1504_s12 = smov 95   ;;  %s1505_s13 = smov 93   ;;  %vm2139_vm14 = vcmask 515072  }
  0x11   : > { %v1380_v1 = vld [vmem:[%s1564_s22 + $0x2] ss:$4 sm:$0x7]  ;;  %1074 = vrot.lane.b32.xlu0 %v1381_v0, %s2120_s23  ;;  %s2123_s14 = smov 110   ;;  %s1507_s19 = smov 94   ;;  %vm1127_vm15 = vcmask 1042432  }
  0x12   : > { %1064 = vrot.lane.b32.xlu1 %v1380_v1, %s1490_s24  ;;  %v1382_v2 = vld [vmem:[%s1564_s22 + $0x2] ss:$4 sm:$0x7]  ;;  %v1356_v19 = vld [vmem:[%s1564_s22 + $0x1] ss:$4 sm:$0x7] }
  0x13   : > { %v1372_v3 = vld [vmem:[%s1564_s22 + $0x2] ss:$4 sm:$0x7]  ;;  %v1357_v20 = vld [vmem:[%s1564_s22 + $0x1] ss:$4 sm:$0x7] }
  0x14   : > { %v1373_v4 = vld [vmem:[%s1564_s22 + $0x2] ss:$4 sm:$0x7]  ;;  %s1509_s20 = smov 125   ;;  %s1510_s21 = smov 124  }
  0x15   : > { %1085 = vrot.lane.b32.xlu0 %v1382_v2, %s2121_s25  ;;  %v1374_v5 = vld [vmem:[%s1564_s22 + $0x2] ss:$4 sm:$0x7]  ;;  %v1349_v31 = vld [vmem:[%s1564_s22 + $0x1] ss:$4 sm:$0x7] }
  0x16   : > { %977 = vrot.lane.b32.xlu1 %v1372_v3, %s1492_s26  ;;  %v1376_v6 = vld [vmem:[%s1564_s22 + $0x2] ss:$4 sm:$0x7]  ;;  %v1348_v32 = vld [vmem:[%s1564_s22 + $0x1] ss:$4 sm:$0x7] }
  0x17   : > { %v1377_v7 = vld [vmem:[%s1564_s22 + $0x2] ss:$4 sm:$0x7]  ;;  %v1352_v33 = vld [vmem:[%s1564_s22 + $0x1] ss:$4 sm:$0x7] }
  0x18   : > { %v1378_v8 = vld [vmem:[%s1564_s22 + $0x2] ss:$4 sm:$0x7]  ;;  %v1351_v34 = vld [vmem:[%s1564_s22 + $0x1] ss:$4 sm:$0x7] }
  0x19   : > { %988 = vrot.lane.b32.xlu0 %v1373_v4, %s2122_s27  ;;  %v1379_v9 = vld [vmem:[%s1564_s22 + $0x2] ss:$4 sm:$0x7]  ;;  %v1354_v35 = vld [vmem:[%s1564_s22 + $0x1] ss:$4 sm:$0x7] }
  0x1a   : > { %999 = vrot.lane.b32.xlu1 %v1374_v5, %s1494_s28  ;;  %v1375_v10 = vld [vmem:[%s1564_s22 + $0x2] ss:$4 sm:$0x7]  ;;  %v1353_v36 = vld [vmem:[%s1564_s22 + $0x1] ss:$4 sm:$0x7] }
  0x1b   : > { %v1364_v11 = vld [vmem:[%s1564_s22 + $0x2] ss:$4 sm:$0x7]  ;;  %v1355_v37 = vld [vmem:[%s1564_s22 + $0x1] ss:$4 sm:$0x7] }
  0x1c   : > { %v1366_v12 = vld [vmem:[%s1564_s22 + $0x2] ss:$4 sm:$0x7]  ;;  %v1350_v38 = vld [vmem:[%s1564_s22 + $0x1] ss:$4 sm:$0x7] }
  0x1d   : > { %1020 = vrot.lane.b32.xlu0 %v1376_v6, %s1495_s29  ;;  %v1367_v13 = vld [vmem:[%s1564_s22 + $0x2] ss:$4 sm:$0x7]  ;;  %v1342_v39 = vld [vmem:[%s1564_s22 + $0x1] ss:$4 sm:$0x7] }
  0x1e   : > { %1031 = vrot.lane.b32.xlu1 %v1377_v7, %s1496_s30  ;;  %v1368_v14 = vld [vmem:[%s1564_s22 + $0x2] ss:$4 sm:$0x7]  ;;  %v1341_v40 = vld [vmem:[%s1564_s22 + $0x1] ss:$4 sm:$0x7] }
  0x1f   : > { %v1369_v15 = vld [vmem:[%s1564_s22 + $0x2] ss:$4 sm:$0x7]  ;;  %v1344_v41 = vld [vmem:[%s1564_s22 + $0x1] ss:$4 sm:$0x7] }
  0x20   : > { %v1371_v16 = vld [vmem:[%s1564_s22 + $0x2] ss:$4 sm:$0x7]  ;;  %v1343_v42 = vld [vmem:[%s1564_s22 + $0x1] ss:$4 sm:$0x7] }
  0x21   : > { %1042 = vrot.lane.b32.xlu0 %v1378_v8, %s1497_s5  ;;  %v1365_v17 = vld [vmem:[%s1564_s22 + $0x2] ss:$4 sm:$0x7]  ;;  %v1347_v43 = vld [vmem:[%s1564_s22 + $0x1] ss:$4 sm:$0x7] }
  0x22   : > { %1053 = vrot.lane.b32.xlu1 %v1379_v9, %s1498_s6  ;;  %v1370_v18 = vld [vmem:[%s1564_s22 + $0x2] ss:$4 sm:$0x7]  ;;  %v1346_v44 = vld [vmem:[%s1564_s22 + $0x1] ss:$4 sm:$0x7] }
  0x23   : > { %v1359_v21 = vld [vmem:[%s1564_s22 + $0x2] ss:$4 sm:$0x7]  ;;  %v1345_v45 = vld [vmem:[%s1564_s22 + $0x1] ss:$4 sm:$0x7] }
  0x24   : > { %v1361_v24 = vld [vmem:[%s1564_s22 + $0x2] ss:$4 sm:$0x7]  ;;  %v1340_v46 = vld [vmem:[%s1564_s22 + $0x1] ss:$4 sm:$0x7] }
  0x25   : > { %1010 = vrot.lane.b32.xlu0 %v1375_v10, %s1499_s7  ;;  %v1362_v25 = vld [vmem:[%s1564_s22 + $0x2] ss:$4 sm:$0x7]  ;;  %v1334_v47 = vld [vmem:[%s1564_s22 + $0x1] ss:$4 sm:$0x7] }
  0x26   : > { %891 = vrot.lane.b32.xlu1 %v1364_v11, %s2118_s8  ;;  %s1508_s8 = smov 127   ;;  %v1358_v26 = vld [vmem:[%s1564_s22 + $0x2] ss:$4 sm:$0x3]  ;;  %v246_v27 = vld [vmem:[%s2114_s1 + $0x8] sm:$0xff] }
  0x27   : > { %v831_v28 = vsel %vm241_vm0, %v1358_v26, 0.0  ;;  %v1363_v29 = vld [vmem:[%s1564_s22 + $0x2] ss:$4 sm:$0x7] }
  0x28   : > { %833 = vst.msk [vmem:[#allocation2 + $0x62] ss:$8 sm:$0x3] %vm1619_vm1, %v831_v28  ;;  %v1360_v30 = vld [vmem:[%s1564_s22 + $0x2] ss:$4 sm:$0x7] }
  0x29   : > { %912 = vrot.lane.b32.xlu0 %v1366_v12, %s1501_s9  ;;  %v552_v48 = vld [vmem:[%s1564_s22] ss:$4 sm:$0x7]  ;;  %v1337_v49 = vld [vmem:[%s1564_s22 + $0x1] ss:$4 sm:$0x7] }
  0x2a   : > { %923 = vrot.lane.b32.xlu1 %v1367_v13, %s1502_s10  ;;  %v1336_v50 = vld [vmem:[%s1564_s22 + $0x1] ss:$4 sm:$0x7]  ;;  %v458_v56 = vld [vmem:[%s1564_s22] ss:$4 sm:$0x7] }
  0x2b   : > { %v1333_v51 = vld [vmem:[%s1564_s22 + $0x1] ss:$4 sm:$0x3]  ;;  %v481_v57 = vld [vmem:[%s1564_s22] ss:$4 sm:$0x7] }
  0x2c   : > { %v566_v52 = vsel %vm241_vm0, %v1333_v51, 0.0  ;;  %v1339_v53 = vld [vmem:[%s1564_s22 + $0x1] ss:$4 sm:$0x7] }
  0x2d   : > { %934 = vrot.lane.b32.xlu0 %v1368_v14, %s1503_s11  ;;  %568 = vst.msk [vmem:[#allocation2 + $0x31] ss:$8 sm:$0x3] %vm1619_vm1, %v566_v52  ;;  %v1338_v54 = vld [vmem:[%s1564_s22 + $0x1] ss:$4 sm:$0x7] }
  0x2e   : > { %945 = vrot.lane.b32.xlu1 %v1369_v15, %s1504_s12  ;;  %v1335_v55 = vld [vmem:[%s1564_s22 + $0x1] ss:$4 sm:$0x7]  ;;  %v493_v58 = vld [vmem:[%s1564_s22] ss:$4 sm:$0x7] }
  0x2f   : > { %v505_v59 = vld [vmem:[%s1564_s22] ss:$4 sm:$0x7] }
  0x30   : > { %v517_v60 = vld [vmem:[%s1564_s22] ss:$4 sm:$0x7] }
  0x31   : > { %966 = vrot.lane.b32.xlu0 %v1371_v16, %s1505_s13  ;;  %v540_v61 = vld [vmem:[%s1564_s22] ss:$4 sm:$0x7] }
  0x32   : > { %902 = vrot.lane.b32.xlu1 %v1365_v17, %s2123_s14  ;;  %v470_v62 = vld [vmem:[%s1564_s22] ss:$4 sm:$0x7] }
  0x33   : > { %v529_v63 = vld [vmem:[%s1564_s22] ss:$4 sm:$0x7] }
  0x34   : > { %v363_v0 = vld [vmem:[%s1564_s22] ss:$4 sm:$0x7] }
  0x35   : > { %956 = vrot.lane.b32.xlu0 %v1370_v18, %s1507_s19  ;;  %v375_v1 = vld [vmem:[%s1564_s22] ss:$4 sm:$0x7] }
  0x36   : > { %809 = vrot.lane.b32.xlu1 %v1356_v19, %s2120_s23  ;;  %s1511_s23 = smov 112   ;;  %v387_v2 = vld [vmem:[%s1564_s22] ss:$4 sm:$0x7] }
  0x37   : > { %v399_v9 = vld [vmem:[%s1564_s22] ss:$4 sm:$0x7] }
  0x38   : > { %v422_v10 = vld [vmem:[%s1564_s22] ss:$4 sm:$0x7] }
  0x39   : > { %820 = vrot.lane.b32.xlu0 %v1357_v20, %s2121_s25  ;;  %s1512_s25 = smov 126   ;;  %v434_v18 = vld [vmem:[%s1564_s22] ss:$4 sm:$0x7] }
  0x3a   : > { %837 = vrot.lane.b32.xlu1 %v1359_v21, %s1508_s8  ;;  %v446_v19 = vld [vmem:[%s1564_s22] ss:$4 sm:$0x7] }
  0x3d   : > { %858 = vrot.lane.b32.xlu0 %v1361_v24, %s1509_s20 }
  0x3e   : > { %869 = vrot.lane.b32.xlu1 %v1362_v25, %s1510_s21 }
  0x41   : > { %880 = vrot.lane.b32.xlu0 %v1363_v29, %s1511_s23 }
  0x42   : > { %848 = vrot.lane.b32.xlu1 %v1360_v30, %s1512_s25  ;;  %v411_v30 = vld [vmem:[%s1564_s22] ss:$4 sm:$0x7] }
  0x45   : > { %723 = vrot.lane.b32.xlu0 %v1348_v32, %s2122_s27  ;;  %s2143_s27 = smov 60  }
  0x46   : > { %734 = vrot.lane.b32.xlu1 %v1349_v31, %s1494_s28  ;;  %v281_v31 = vld [vmem:[%s1564_s22] ss:$4 sm:$0x7] }
  0x49   : > { %755 = vrot.lane.b32.xlu0 %v1351_v34, %s1495_s29 }
  0x4a   : > { %766 = vrot.lane.b32.xlu1 %v1352_v33, %s1496_s30 }
  0x4d   : > { %777 = vrot.lane.b32.xlu0 %v1353_v36, %s1497_s5 }
  0x4e   : > { %788 = vrot.lane.b32.xlu1 %v1354_v35, %s1498_s6 }
  0x51   : > { %745 = vrot.lane.b32.xlu0 %v1350_v38, %s1499_s7  ;;  %v304_v38 = vld [vmem:[%s1564_s22] ss:$4 sm:$0x7] }
  0x52   : > { %799 = vrot.lane.b32.xlu1 %v1355_v37, %s1490_s24 }
  0x55   : > { %647 = vrot.lane.b32.xlu0 %v1341_v40, %s1501_s9 }
  0x56   : > { %658 = vrot.lane.b32.xlu1 %v1342_v39, %s1502_s10 }
  0x59   : > { %669 = vrot.lane.b32.xlu0 %v1343_v42, %s1503_s11  ;;  %v273_v42 = vld [vmem:[%s1564_s22] ss:$4 sm:$0x3] }
  0x5a   : > { %680 = vrot.lane.b32.xlu1 %v1344_v41, %s1504_s12  ;;  %v316_v41 = vld [vmem:[%s1564_s22] ss:$4 sm:$0x7]  ;;  %v274_v51 = vsel %vm241_vm0, %v273_v42, 0.0 }
  0x5b   : > { %279 = vst.msk [vmem:[#allocation2] ss:$8 sm:$0x3] %vm1619_vm1, %v274_v51 }
  0x5d   : > { %701 = vrot.lane.b32.xlu0 %v1346_v44, %s1505_s13 }
  0x5e   : > { %712 = vrot.lane.b32.xlu1 %v1347_v43, %s1492_s26 }
  0x61   : > { %637 = vrot.lane.b32.xlu0 %v1340_v46, %s2123_s14  ;;  %s2145_s14 = smov 61  }
  0x62   : > { %691 = vrot.lane.b32.xlu1 %v1345_v45, %s1507_s19 }
  0x65   : > { %554 = vrot.lane.b32.xlu0 %v552_v48, %s2143_s27  ;;  %s2144_s27 = smov 111  }
  0x66   : > { %572 = vrot.lane.b32.xlu1 %v1334_v47, %s1508_s8 }
  0x69   : > { %593 = vrot.lane.b32.xlu0 %v1336_v50, %s1509_s20 }
  0x6a   : > { %604 = vrot.lane.b32.xlu1 %v1337_v49, %s1510_s21 }
  0x6d   : > { %615 = vrot.lane.b32.xlu0 %v1338_v54, %s1511_s23  ;;  %v328_v54 = vld [vmem:[%s1564_s22] ss:$4 sm:$0x7] }
  0x6e   : > { %626 = vrot.lane.b32.xlu1 %v1339_v53, %s2144_s27 }
  0x71   : > { %583 = vrot.lane.b32.xlu0 %v1335_v55, %s1512_s25 }
  0x72   : > { %460 = vrot.lane.b32.xlu1 %v458_v56, %s1494_s28 }
  0x75   : > { %483 = vrot.lane.b32.xlu0 %v481_v57, %s1495_s29 }
  0x76   : > { %495 = vrot.lane.b32.xlu1 %v493_v58, %s1496_s30 }
  0x79   : > { %507 = vrot.lane.b32.xlu0 %v505_v59, %s1497_s5  ;;  %v340_v59 = vld [vmem:[%s1564_s22] ss:$4 sm:$0x7] }
  0x7a   : > { %519 = vrot.lane.b32.xlu1 %v517_v60, %s1498_s6 }
  0x7d   : > { %542 = vrot.lane.b32.xlu0 %v540_v61, %s2145_s14 }
  0x7e   : > { %472 = vrot.lane.b32.xlu1 %v470_v62, %s1499_s7 }
  0x81   : > { %531 = vrot.lane.b32.xlu0 %v529_v63, %s1490_s24  ;;  %s2146_s24 = smov 80  }
  0x82   : > { %365 = vrot.lane.b32.xlu1 %v363_v0, %s1501_s9  ;;  %v293_v0 = vld [vmem:[%s1564_s22] ss:$4 sm:$0x7] }
  0x83   : > { %v1075_v3 = vpop.permute.xlu0 %1074 }
  0x84   : > { %v1065_v4 = vpop.permute.xlu1 %1064  ;;  %v1076_v5 = vrot.slane %v1075_v3, 1 }
  0x85   : > { %v1066_v6 = vrot.slane %v1065_v4, 1  ;;  %377 = vrot.lane.b32.xlu0 %v375_v1, %s1502_s10 }
  0x86   : > { %389 = vrot.lane.b32.xlu1 %v387_v2, %s1503_s11  ;;  %v1077_v7 = vsel %vm2133_vm2, %v1075_v3, %v1076_v5 }
  0x87   : > { %v1067_v8 = vsel %vm2125_vm3, %v1065_v4, %v1066_v6  ;;  %v1079_v11 = vsel %vm243_vm4, %v1077_v7, 0.0  ;;  %v1086_v12 = vpop.permute.xlu0 %1085  ;;  %vm2129_vm3 = vcmask 891904   ;;  %v352_v4 = vld [vmem:[%s1564_s22] ss:$4 sm:$0x7]  ;;  %v1513_v7 = vmov 0.0  }
  0x88   : > { %1070 = vst.msk [vmem:[#allocation2 + $0x90] ss:$8 sm:$0x3] %vm1619_vm1, %v1067_v8  ;;  %v978_v13 = vpop.permute.xlu1 %977  ;;  %1081 = vst.msk [vmem:[#allocation2 + $0x91] ss:$8 sm:$0x3] %vm1619_vm1, %v1079_v11  ;;  %1198 = vmatprep.mubr.f32.mxu0 %v1513_v7  ;;  %1210 = vmatprep.mubr.f32.mxu1 %v1513_v7 }
  0x89   : > { %v1087_v14 = vrot.slane %v1086_v12, 1  ;;  %v979_v15 = vrot.slane %v978_v13, 1  ;;  %401 = vrot.lane.b32.xlu0 %v399_v9, %s1504_s12 }
  0x8a   : > { %424 = vrot.lane.b32.xlu1 %v422_v10, %s1505_s13 }
  0x8b   : > { %v1088_v16 = vsel %vm2135_vm5, %v1086_v12, %v1087_v14  ;;  %v980_v17 = vsel %vm2124_vm6, %v978_v13, %v979_v15  ;;  %v989_v22 = vpop.permute.xlu0 %988  ;;  %vm2128_vm6 = vcmask 637952  }
  0x8c   : > { %v1090_v20 = vsel %vm244_vm7, %v1088_v16, 0.0  ;;  %v982_v21 = vsel %vm244_vm7, %v980_v17, 0.0  ;;  %v1000_v24 = vpop.permute.xlu1 %999  ;;  %v990_v25 = vrot.slane %v989_v22, 1 }
  0x8d   : > { %1092 = vst.msk [vmem:[#allocation2 + $0x92] ss:$8 sm:$0x3] %vm1619_vm1, %v1090_v20  ;;  %984 = vst.msk [vmem:[#allocation2 + $0x80] ss:$8 sm:$0x3] %vm1619_vm1, %v982_v21  ;;  %436 = vrot.lane.b32.xlu0 %v434_v18, %s1492_s26 }
  0x8e   : > { %v1001_v26 = vrot.slane %v1000_v24, 1  ;;  %448 = vrot.lane.b32.xlu1 %v446_v19, %s2146_s24  ;;  %v991_v28 = vsel %vm2137_vm8, %v989_v22, %v990_v25  ;;  %v250_v25 = vld [vmem:[%s2115_s2 + $0x8] sm:$0xff] }
  0x8f   : > { %v993_v32 = vsel %vm241_vm0, %v991_v28, 0.0  ;;  %v1021_v34 = vpop.permute.xlu0 %1020 }
  0x90   : > { %v1002_v29 = vsel %vm463_vm9, %v1000_v24, %v1001_v26  ;;  %v1032_v35 = vpop.permute.xlu1 %1031  ;;  %995 = vst.msk [vmem:[#allocation2 + $0x81] ss:$8 sm:$0x3] %vm1619_vm1, %v993_v32  ;;  %v1022_v36 = vrot.slane %v1021_v34, 1  ;;  %v249_v26 = vld [vmem:[%s2115_s2] sm:$0xff] }
  0x91   : > { %v1004_v33 = vsel %vm242_vm10, %v1002_v29, 0.0  ;;  %v1033_v37 = vrot.slane %v1032_v35, 1  ;;  %413 = vrot.lane.b32.xlu0 %v411_v30, %s1507_s19  ;;  %v1514_v30 = vmov 0   ;;  %s1391_s19 = sshll.u32 %s2181_s15, 6 }
  0x92   : > { %1006 = vst.msk [vmem:[#allocation2 + $0x82] ss:$8 sm:$0x3] %vm1619_vm1, %v1004_v33  ;;  %283 = vrot.lane.b32.xlu1 %v281_v31, %s1508_s8  ;;  %v1023_v39 = vsel %vm2140_vm11, %v1021_v34, %v1022_v36  ;;  %1463 = vset.pattern.permute.xlu0 %v1514_v30  ;;  %v251_v36 = vld [vmem:[%s2115_s2 + $0x10] sm:$0xff] }
  0x93   : > { %v1034_v40 = vsel %vm2138_vm12, %v1032_v35, %v1033_v37  ;;  %v1025_v43 = vsel %vm243_vm4, %v1023_v39, 0.0  ;;  %v1043_v45 = vpop.permute.xlu0 %1042  ;;  %1464 = vset.pattern.permute.xlu1 %v1514_v30  ;;  %v252_v37 = vld [vmem:[%s2115_s2 + $0x18] sm:$0xff] }
  0x94   : > { %v1036_v44 = vsel %vm244_vm7, %v1034_v40, 0.0  ;;  %v1054_v46 = vpop.permute.xlu1 %1053  ;;  %v1113_v47 = vld [vmem:[#allocation2 + $0x98] sm:$0x7]  ;;  %v1112_v48 = vld [vmem:[#allocation2 + $0x90] sm:$0x7]  ;;  %v1044_v49 = vrot.slane %v1043_v45, 1 }
  0x95   : > { %1027 = vst.msk [vmem:[#allocation2 + $0x84] ss:$8 sm:$0x3] %vm1619_vm1, %v1025_v43  ;;  %1038 = vst.msk [vmem:[#allocation2 + $0x85] ss:$8 sm:$0x3] %vm1619_vm1, %v1036_v44  ;;  %1383 = vmatprep.subr.msk.mxu0 %vm1127_vm15, %v1113_v47  ;;  %1392 = vmatprep.subr.msk.mxu1 %vm1127_vm15, %v1113_v47 }
  0x96   : > { %v1055_v50 = vrot.slane %v1054_v46, 1  ;;  %1384 = vmatpush1.msk.msra.mxu0 %vm1127_vm15, %v1112_v48  ;;  %1402 = vmatpush1.msk.msra.mxu1 %vm1127_vm15, %v1112_v48  ;;  %v1045_v52 = vsel %vm2126_vm13, %v1043_v45, %v1044_v49  ;;  %vm2127_vm15 = vcmask 908288   ;;  %vm2130_vm13 = vcmask 883712  }
  0x97   : > { %306 = vrot.lane.b32.xlu0 %v304_v38, %s1509_s20  ;;  %318 = vrot.lane.b32.xlu1 %v316_v41, %s1510_s21  ;;  %v1047_v55 = vsel %vm241_vm0, %v1045_v52, 0.0  ;;  %v1011_v57 = vpop.permute.xlu0 %1010 }
  0x98   : > { %v1056_v53 = vsel %vm2139_vm14, %v1054_v46, %v1055_v50  ;;  %v892_v58 = vpop.permute.xlu1 %891  ;;  %1049 = vst.msk [vmem:[#allocation2 + $0x86] ss:$8 sm:$0x3] %vm1619_vm1, %v1047_v55  ;;  %v1012_v60 = vrot.slane %v1011_v57, 1 }
  0x99   : > { %v1058_v56 = vsel %vm242_vm10, %v1056_v53, 0.0  ;;  %v893_v61 = vrot.slane %v892_v58, 1 }
  0x9a   : > { %1060 = vst.msk [vmem:[#allocation2 + $0x87] ss:$8 sm:$0x3] %vm1619_vm1, %v1058_v56  ;;  %v1013_v62 = vsel %vm2128_vm6, %v1011_v57, %v1012_v60  ;;  %vm404_vm6 = vcmask 777216  }
  0x9b   : > { %v894_v63 = vsel %vm2127_vm15, %v892_v58, %v893_v61  ;;  %330 = vrot.lane.b32.xlu0 %v328_v54, %s1511_s23  ;;  %342 = vrot.lane.b32.xlu1 %v340_v59, %s2144_s27  ;;  %1016 = vst.msk [vmem:[#allocation2 + $0x83] ss:$8 sm:$0x3] %vm1619_vm1, %v1013_v62  ;;  %v913_v2 = vpop.permute.xlu0 %912  ;;  %s2147_s23 = smov 110   ;;  %vm2131_vm15 = vcmask 785408   ;;  %s238_s27 = scalar_lea.vmem %s2117_s4, %s1391_s19 }
  0x9c   : > { %v896_v1 = vsel %vm242_vm10, %v894_v63, 0.0  ;;  %v924_v3 = vpop.permute.xlu1 %923  ;;  %v914_v5 = vrot.slane %v913_v2, 1 }
  0x9d   : > { %898 = vst.msk [vmem:[#allocation2 + $0x70] ss:$8 sm:$0x3] %vm1619_vm1, %v896_v1  ;;  %v925_v6 = vrot.slane %v924_v3, 1 }
  0x9e   : > { %v915_v8 = vsel %vm2129_vm3, %v913_v2, %v914_v5  ;;  %vm427_vm3 = vcmask 760832  }
  0x9f   : > { %v926_v9 = vsel %vm2130_vm13, %v924_v3, %v925_v6  ;;  %295 = vrot.lane.b32.xlu0 %v293_v0, %s1512_s25  ;;  %354 = vrot.lane.b32.xlu1 %v352_v4, %s2147_s23  ;;  %v917_v10 = vsel %vm243_vm4, %v915_v8, 0.0  ;;  %v935_v12 = vpop.permute.xlu0 %934  ;;  %vm2132_vm13 = vcmask 900096  }
  0xa0   : > { %v928_v11 = vsel %vm244_vm7, %v926_v9, 0.0  ;;  %v946_v13 = vpop.permute.xlu1 %945  ;;  %919 = vst.msk [vmem:[#allocation2 + $0x72] ss:$8 sm:$0x3] %vm1619_vm1, %v917_v10  ;;  %v936_v14 = vrot.slane %v935_v12, 1 }
  0xa1   : > { %930 = vst.msk [vmem:[#allocation2 + $0x73] ss:$8 sm:$0x3] %vm1619_vm1, %v928_v11  ;;  %v947_v15 = vrot.slane %v946_v13, 1 }
  0xa2   : > { %v937_v16 = vsel %vm2131_vm15, %v935_v12, %v936_v14  ;;  %v1111_v18 = vld [vmem:[#allocation2 + $0x88] sm:$0xff]  ;;  %v1110_v19 = vld [vmem:[#allocation2 + $0x80] sm:$0xff]  ;;  %vm2134_vm15 = vcmask 769024  }
  0xa3   : > { %v948_v17 = vsel %vm404_vm6, %v946_v13, %v947_v15  ;;  %v939_v20 = vsel %vm241_vm0, %v937_v16, 0.0  ;;  %1148 = vmatprep.subr.mxu0 %v1111_v18  ;;  %1393 = vmatprep.subr.mxu1 %v1111_v18  ;;  %v967_v22 = vpop.permute.xlu0 %966 }
  0xa4   : > { %v950_v21 = vsel %vm242_vm10, %v948_v17, 0.0  ;;  %v903_v24 = vpop.permute.xlu1 %902  ;;  %941 = vst.msk [vmem:[#allocation2 + $0x74] ss:$8 sm:$0x3] %vm1619_vm1, %v939_v20  ;;  %v968_v28 = vrot.slane %v967_v22, 1  ;;  %1149 = vmatpush1.msra.mxu0 %v1110_v19  ;;  %1403 = vmatpush1.msra.mxu1 %v1110_v19 }
  0xa5   : > { %952 = vst.msk [vmem:[#allocation2 + $0x75] ss:$8 sm:$0x3] %vm1619_vm1, %v950_v21  ;;  %v904_v29 = vrot.slane %v903_v24, 1  ;;  %260 = vperm.xlu1 %1464, %v250_v25   ;;  %255 = vperm.xlu0 %1463, %v249_v26  }
  0xa6   : > { %v969_v31 = vsel %vm427_vm3, %v967_v22, %v968_v28 }
  0xa7   : > { %v905_v32 = vsel %vm2132_vm13, %v903_v24, %v904_v29  ;;  %v971_v33 = vsel %vm243_vm4, %v969_v31, 0.0  ;;  %v957_v34 = vpop.permute.xlu0 %956  ;;  %vm2136_vm13 = vcmask 1039360  }
  0xa8   : > { %908 = vst.msk [vmem:[#allocation2 + $0x71] ss:$8 sm:$0x3] %vm1619_vm1, %v905_v32  ;;  %v810_v35 = vpop.permute.xlu1 %809  ;;  %973 = vst.msk [vmem:[#allocation2 + $0x77] ss:$8 sm:$0x3] %vm1619_vm1, %v971_v33 }
  0xa9   : > { %v958_v38 = vrot.slane %v957_v34, 1  ;;  %v811_v39 = vrot.slane %v810_v35, 1  ;;  %265 = vperm.xlu1 %1464, %v251_v36   ;;  %270 = vperm.xlu0 %1463, %v252_v37  }
  0xab   : > { %v959_v40 = vsel %vm2134_vm15, %v957_v34, %v958_v38  ;;  %v812_v41 = vsel %vm2133_vm2, %v810_v35, %v811_v39  ;;  %v821_v43 = vpop.permute.xlu0 %820  ;;  %vm309_vm2 = vcmask 1022976   ;;  %vm321_vm15 = vcmask 1014784  }
  0xac   : > { %962 = vst.msk [vmem:[#allocation2 + $0x76] ss:$8 sm:$0x3] %vm1619_vm1, %v959_v40  ;;  %v814_v42 = vsel %vm243_vm4, %v812_v41, 0.0  ;;  %v838_v44 = vpop.permute.xlu1 %837  ;;  %v822_v45 = vrot.slane %v821_v43, 1 }
  0xad   : > { %816 = vst.msk [vmem:[#allocation2 + $0x60] ss:$8 sm:$0x3] %vm1619_vm1, %v814_v42  ;;  %v839_v46 = vrot.slane %v838_v44, 1 }
  0xae   : > { %v823_v47 = vsel %vm2135_vm5, %v821_v43, %v822_v45  ;;  %vm333_vm5 = vcmask 916480  }
  0xaf   : > { %v840_v48 = vsel %vm2136_vm13, %v838_v44, %v839_v46  ;;  %v825_v49 = vsel %vm244_vm7, %v823_v47, 0.0  ;;  %v859_v51 = vpop.permute.xlu0 %858  ;;  %vm298_vm13 = vcmask 1031168  }
  0xb0   : > { %v842_v50 = vsel %vm242_vm10, %v840_v48, 0.0  ;;  %v870_v52 = vpop.permute.xlu1 %869  ;;  %827 = vst.msk [vmem:[#allocation2 + $0x61] ss:$8 sm:$0x3] %vm1619_vm1, %v825_v49  ;;  %v860_v53 = vrot.slane %v859_v51, 1 }
  0xb1   : > { %844 = vst.msk [vmem:[#allocation2 + $0x63] ss:$8 sm:$0x3] %vm1619_vm1, %v842_v50  ;;  %v871_v54 = vrot.slane %v870_v52, 1 }
  0xb2   : > { %v861_v55 = vsel %vm309_vm2, %v859_v51, %v860_v53 }
  0xb3   : > { %v872_v56 = vsel %vm321_vm15, %v870_v52, %v871_v54  ;;  %v1109_v57 = vld [vmem:[#allocation2 + $0x78] sm:$0xff]  ;;  %v1108_v58 = vld [vmem:[#allocation2 + $0x70] sm:$0xff]  ;;  %v863_v59 = vsel %vm243_vm4, %v861_v55, 0.0  ;;  %v881_v61 = vpop.permute.xlu0 %880 }
  0xb4   : > { %v874_v60 = vsel %vm244_vm7, %v872_v56, 0.0  ;;  %1150 = vmatprep.subr.mxu0 %v1109_v57  ;;  %1394 = vmatprep.subr.mxu1 %v1109_v57  ;;  %v849_v62 = vpop.permute.xlu1 %848  ;;  %865 = vst.msk [vmem:[#allocation2 + $0x65] ss:$8 sm:$0x3] %vm1619_vm1, %v863_v59  ;;  %v882_v63 = vrot.slane %v881_v61, 1 }
  0xb5   : > { %876 = vst.msk [vmem:[#allocation2 + $0x66] ss:$8 sm:$0x3] %vm1619_vm1, %v874_v60  ;;  %v850_v0 = vrot.slane %v849_v62, 1  ;;  %1151 = vmatpush1.msra.mxu0 %v1108_v58  ;;  %1404 = vmatpush1.msra.mxu1 %v1108_v58 }
  0xb6   : > { %v883_v1 = vsel %vm333_vm5, %v881_v61, %v882_v63 }
  0xb7   : > { %v851_v2 = vsel %vm298_vm13, %v849_v62, %v850_v0  ;;  %v885_v3 = vsel %vm241_vm0, %v883_v1, 0.0  ;;  %v724_v5 = vpop.permute.xlu0 %723 }
  0xb8   : > { %854 = vst.msk [vmem:[#allocation2 + $0x64] ss:$8 sm:$0x3] %vm1619_vm1, %v851_v2  ;;  %v735_v4 = vpop.permute.xlu1 %734  ;;  %887 = vst.msk [vmem:[#allocation2 + $0x67] ss:$8 sm:$0x3] %vm1619_vm1, %v885_v3 }
  0xb9   : > { %v736_v6 = vrot.slane %v735_v4, 1  ;;  %v725_v8 = vrot.slane %v724_v5, 1 }
  0xbb   : > { %v737_v9 = vsel %vm463_vm9, %v735_v4, %v736_v6  ;;  %v726_v10 = vsel %vm2137_vm8, %v724_v5, %v725_v8  ;;  %v756_v14 = vpop.permute.xlu0 %755  ;;  %vm2148_vm8 = vcmask 523264  }
  0xbc   : > { %v739_v11 = vsel %vm242_vm10, %v737_v9, 0.0  ;;  %v728_v12 = vsel %vm241_vm0, %v726_v10, 0.0  ;;  %v767_v13 = vpop.permute.xlu1 %766  ;;  %v757_v16 = vrot.slane %v756_v14, 1 }
  0xbd   : > { %741 = vst.msk [vmem:[#allocation2 + $0x51] ss:$8 sm:$0x3] %vm1619_vm1, %v739_v11  ;;  %730 = vst.msk [vmem:[#allocation2 + $0x50] ss:$8 sm:$0x3] %vm1619_vm1, %v728_v12 }
  0xbe   : > { %v768_v15 = vrot.slane %v767_v13, 1  ;;  %v758_v18 = vsel %vm2140_vm11, %v756_v14, %v757_v16  ;;  %vm2152_vm11 = vcmask 891904  }
  0xbf   : > { %v760_v20 = vsel %vm243_vm4, %v758_v18, 0.0  ;;  %v778_v22 = vpop.permute.xlu0 %777  ;;  %v1107_v24 = vld [vmem:[#allocation2 + $0x68] sm:$0xff]  ;;  %v1106_v25 = vld [vmem:[#allocation2 + $0x60] sm:$0xff] }
  0xc0   : > { %v769_v17 = vsel %vm2138_vm12, %v767_v13, %v768_v15  ;;  %v789_v21 = vpop.permute.xlu1 %788  ;;  %762 = vst.msk [vmem:[#allocation2 + $0x53] ss:$8 sm:$0x3] %vm1619_vm1, %v760_v20  ;;  %v779_v28 = vrot.slane %v778_v22, 1  ;;  %1152 = vmatprep.subr.mxu0 %v1107_v24  ;;  %1395 = vmatprep.subr.mxu1 %v1107_v24  ;;  %vm2149_vm12 = vcmask 506880  }
  0xc1   : > { %v771_v19 = vsel %vm244_vm7, %v769_v17, 0.0  ;;  %v790_v26 = vrot.slane %v789_v21, 1  ;;  %1153 = vmatpush1.msra.mxu0 %v1106_v25  ;;  %1405 = vmatpush1.msra.mxu1 %v1106_v25 }
  0xc2   : > { %773 = vst.msk [vmem:[#allocation2 + $0x54] ss:$8 sm:$0x3] %vm1619_vm1, %v771_v19  ;;  %v780_v30 = vsel %vm2148_vm8, %v778_v22, %v779_v28  ;;  %vm2151_vm8 = vcmask 883712  }
  0xc3   : > { %v791_v29 = vsel %vm2139_vm14, %v789_v21, %v790_v26  ;;  %v782_v32 = vsel %vm241_vm0, %v780_v30, 0.0  ;;  %v746_v34 = vpop.permute.xlu0 %745  ;;  %vm2150_vm14 = vcmask 637952  }
  0xc4   : > { %v793_v31 = vsel %vm242_vm10, %v791_v29, 0.0  ;;  %v800_v33 = vpop.permute.xlu1 %799  ;;  %784 = vst.msk [vmem:[#allocation2 + $0x55] ss:$8 sm:$0x3] %vm1619_vm1, %v782_v32  ;;  %v747_v36 = vrot.slane %v746_v34, 1 }
  0xc5   : > { %795 = vst.msk [vmem:[#allocation2 + $0x56] ss:$8 sm:$0x3] %vm1619_vm1, %v793_v31  ;;  %v801_v35 = vrot.slane %v800_v33, 1 }
  0xc6   : > { %v748_v38 = vsel %vm2150_vm14, %v746_v34, %v747_v36  ;;  %vm2155_vm14 = vcmask 769024  }
  0xc7   : > { %v802_v37 = vsel %vm2149_vm12, %v800_v33, %v801_v35  ;;  %751 = vst.msk [vmem:[#allocation2 + $0x52] ss:$8 sm:$0x3] %vm1619_vm1, %v748_v38  ;;  %v648_v40 = vpop.permute.xlu0 %647  ;;  %vm2153_vm12 = vcmask 785408  }
  0xc8   : > { %805 = vst.msk [vmem:[#allocation2 + $0x57] ss:$8 sm:$0x3] %vm1619_vm1, %v802_v37  ;;  %v659_v39 = vpop.permute.xlu1 %658  ;;  %v649_v42 = vrot.slane %v648_v40, 1 }
  0xc9   : > { %v660_v41 = vrot.slane %v659_v39, 1 }
  0xca   : > { %v650_v44 = vsel %vm2152_vm11, %v648_v40, %v649_v42  ;;  %vm2154_vm11 = vcmask 752640  }
  0xcb   : > { %v661_v43 = vsel %vm2151_vm8, %v659_v39, %v660_v41  ;;  %v652_v46 = vsel %vm243_vm4, %v650_v44, 0.0  ;;  %v670_v48 = vpop.permute.xlu0 %669  ;;  %vm2156_vm8 = vcmask 900096  }
  0xcc   : > { %v663_v45 = vsel %vm244_vm7, %v661_v43, 0.0  ;;  %v681_v47 = vpop.permute.xlu1 %680  ;;  %654 = vst.msk [vmem:[#allocation2 + $0x41] ss:$8 sm:$0x3] %vm1619_vm1, %v652_v46  ;;  %v671_v50 = vrot.slane %v670_v48, 1 }
  0xcd   : > { %665 = vst.msk [vmem:[#allocation2 + $0x42] ss:$8 sm:$0x3] %vm1619_vm1, %v663_v45  ;;  %v682_v49 = vrot.slane %v681_v47, 1 }
  0xce   : > { %v672_v52 = vsel %vm2153_vm12, %v670_v48, %v671_v50  ;;  %vm2157_vm12 = vcmask 1039360  }
  0xcf   : > { %v683_v51 = vsel %vm404_vm6, %v681_v47, %v682_v49  ;;  %v1105_v53 = vld [vmem:[#allocation2 + $0x58] sm:$0xff]  ;;  %v1104_v54 = vld [vmem:[#allocation2 + $0x50] sm:$0xff]  ;;  %v674_v56 = vsel %vm241_vm0, %v672_v52, 0.0  ;;  %v702_v58 = vpop.permute.xlu0 %701 }
  0xd0   : > { %v685_v55 = vsel %vm242_vm10, %v683_v51, 0.0  ;;  %1154 = vmatprep.subr.mxu0 %v1105_v53  ;;  %1396 = vmatprep.subr.mxu1 %v1105_v53  ;;  %v713_v57 = vpop.permute.xlu1 %712  ;;  %676 = vst.msk [vmem:[#allocation2 + $0x43] ss:$8 sm:$0x3] %vm1619_vm1, %v674_v56  ;;  %v703_v60 = vrot.slane %v702_v58, 1 }
  0xd1   : > { %687 = vst.msk [vmem:[#allocation2 + $0x44] ss:$8 sm:$0x3] %vm1619_vm1, %v685_v55  ;;  %v714_v59 = vrot.slane %v713_v57, 1  ;;  %1155 = vmatpush1.msra.mxu0 %v1104_v54  ;;  %1406 = vmatpush1.msra.mxu1 %v1104_v54 }
  0xd2   : > { %v704_v62 = vsel %vm427_vm3, %v702_v58, %v703_v60 }
  0xd3   : > { %v715_v61 = vsel %vm2154_vm11, %v713_v57, %v714_v59  ;;  %v706_v0 = vsel %vm243_vm4, %v704_v62, 0.0  ;;  %v638_v2 = vpop.permute.xlu0 %637  ;;  %vm2158_vm11 = vcmask 490496  }
  0xd4   : > { %v717_v63 = vsel %vm244_vm7, %v715_v61, 0.0  ;;  %v692_v1 = vpop.permute.xlu1 %691  ;;  %708 = vst.msk [vmem:[#allocation2 + $0x46] ss:$8 sm:$0x3] %vm1619_vm1, %v706_v0  ;;  %v639_v4 = vrot.slane %v638_v2, 1 }
  0xd5   : > { %719 = vst.msk [vmem:[#allocation2 + $0x47] ss:$8 sm:$0x3] %vm1619_vm1, %v717_v63  ;;  %v693_v3 = vrot.slane %v692_v1, 1 }
  0xd6   : > { %v640_v6 = vsel %vm2156_vm8, %v638_v2, %v639_v4  ;;  %vm2160_vm8 = vcmask 629760  }
  0xd7   : > { %v694_v5 = vsel %vm2155_vm14, %v692_v1, %v693_v3  ;;  %643 = vst.msk [vmem:[#allocation2 + $0x40] ss:$8 sm:$0x3] %vm1619_vm1, %v640_v6  ;;  %v555_v9 = vpop.permute.xlu0 %554  ;;  %vm2159_vm14 = vcmask 908288  }
  0xd8   : > { %697 = vst.msk [vmem:[#allocation2 + $0x45] ss:$8 sm:$0x3] %vm1619_vm1, %v694_v5  ;;  %v573_v8 = vpop.permute.xlu1 %572  ;;  %v556_v11 = vrot.slane %v555_v9, 1 }
  0xd9   : > { %v574_v10 = vrot.slane %v573_v8, 1 }
  0xda   : > { %v558_v13 = vsel %vm2158_vm11, %v555_v9, %v556_v11  ;;  %vm2163_vm11 = vcmask 515072  }
  0xdb   : > { %v575_v12 = vsel %vm2157_vm12, %v573_v8, %v574_v10  ;;  %v560_v15 = vsel %vm244_vm7, %v558_v13, 0.0  ;;  %v594_v17 = vpop.permute.xlu0 %593  ;;  %vm2161_vm12 = vcmask 621568  }
  0xdc   : > { %v577_v14 = vsel %vm242_vm10, %v575_v12, 0.0  ;;  %v605_v16 = vpop.permute.xlu1 %604  ;;  %562 = vst.msk [vmem:[#allocation2 + $0x30] ss:$8 sm:$0x3] %vm1619_vm1, %v560_v15  ;;  %v595_v19 = vrot.slane %v594_v17, 1 }
  0xdd   : > { %579 = vst.msk [vmem:[#allocation2 + $0x32] ss:$8 sm:$0x3] %vm1619_vm1, %v577_v14  ;;  %v606_v18 = vrot.slane %v605_v16, 1 }
  0xde   : > { %v596_v21 = vsel %vm309_vm2, %v594_v17, %v595_v19 }
  0xdf   : > { %v607_v20 = vsel %vm321_vm15, %v605_v16, %v606_v18  ;;  %v1103_v22 = vld [vmem:[#allocation2 + $0x48] sm:$0xff]  ;;  %v1102_v24 = vld [vmem:[#allocation2 + $0x40] sm:$0xff]  ;;  %v598_v26 = vsel %vm243_vm4, %v596_v21, 0.0  ;;  %v616_v29 = vpop.permute.xlu0 %615 }
  0xe0   : > { %v609_v25 = vsel %vm244_vm7, %v607_v20, 0.0  ;;  %1156 = vmatprep.subr.mxu0 %v1103_v22  ;;  %1397 = vmatprep.subr.mxu1 %v1103_v22  ;;  %v627_v28 = vpop.permute.xlu1 %626  ;;  %600 = vst.msk [vmem:[#allocation2 + $0x34] ss:$8 sm:$0x3] %vm1619_vm1, %v598_v26  ;;  %v617_v31 = vrot.slane %v616_v29, 1 }
  0xe1   : > { %611 = vst.msk [vmem:[#allocation2 + $0x35] ss:$8 sm:$0x3] %vm1619_vm1, %v609_v25  ;;  %v628_v30 = vrot.slane %v627_v28, 1  ;;  %1157 = vmatpush1.msra.mxu0 %v1102_v24  ;;  %1407 = vmatpush1.msra.mxu1 %v1102_v24 }
  0xe2   : > { %v618_v33 = vsel %vm333_vm5, %v616_v29, %v617_v31 }
  0xe3   : > { %v629_v32 = vsel %vm2159_vm14, %v627_v28, %v628_v30  ;;  %v620_v35 = vsel %vm241_vm0, %v618_v33, 0.0  ;;  %v584_v36 = vpop.permute.xlu0 %583  ;;  %vm2164_vm14 = vcmask 498688  }
  0xe4   : > { %v631_v34 = vsel %vm242_vm10, %v629_v32, 0.0  ;;  %v461_v37 = vpop.permute.xlu1 %460  ;;  %622 = vst.msk [vmem:[#allocation2 + $0x36] ss:$8 sm:$0x3] %vm1619_vm1, %v620_v35  ;;  %v585_v38 = vrot.slane %v584_v36, 1 }
  0xe5   : > { %633 = vst.msk [vmem:[#allocation2 + $0x37] ss:$8 sm:$0x3] %vm1619_vm1, %v631_v34  ;;  %v462_v39 = vrot.slane %v461_v37, 1 }
  0xe6   : > { %v586_v40 = vsel %vm298_vm13, %v584_v36, %v585_v38 }
  0xe7   : > { %v464_v41 = vsel %vm463_vm9, %v461_v37, %v462_v39  ;;  %589 = vst.msk [vmem:[#allocation2 + $0x33] ss:$8 sm:$0x3] %vm1619_vm1, %v586_v40  ;;  %v484_v43 = vpop.permute.xlu0 %483  ;;  %vm2162_vm9 = vcmask 523264  }
  0xe8   : > { %v466_v42 = vsel %vm242_vm10, %v464_v41, 0.0  ;;  %v496_v44 = vpop.permute.xlu1 %495  ;;  %v485_v45 = vrot.slane %v484_v43, 1 }
  0xe9   : > { %468 = vst.msk [vmem:[#allocation2 + $0x20] ss:$8 sm:$0x3] %vm1619_vm1, %v466_v42  ;;  %v497_v46 = vrot.slane %v496_v44, 1 }
  0xea   : > { %v487_v47 = vsel %vm2160_vm8, %v484_v43, %v485_v45  ;;  %vm2165_vm8 = vcmask 637952  }
  0xeb   : > { %v499_v48 = vsel %vm2161_vm12, %v496_v44, %v497_v46  ;;  %v489_v49 = vsel %vm243_vm4, %v487_v47, 0.0  ;;  %v508_v51 = vpop.permute.xlu0 %507  ;;  %vm2166_vm12 = vcmask 506880  }
  0xec   : > { %v501_v50 = vsel %vm244_vm7, %v499_v48, 0.0  ;;  %v520_v52 = vpop.permute.xlu1 %519  ;;  %491 = vst.msk [vmem:[#allocation2 + $0x22] ss:$8 sm:$0x3] %vm1619_vm1, %v489_v49  ;;  %v509_v53 = vrot.slane %v508_v51, 1 }
  0xed   : > { %503 = vst.msk [vmem:[#allocation2 + $0x23] ss:$8 sm:$0x3] %vm1619_vm1, %v501_v50  ;;  %v521_v54 = vrot.slane %v520_v52, 1 }
  0xee   : > { %v511_v55 = vsel %vm2162_vm9, %v508_v51, %v509_v53  ;;  %v1101_v57 = vld [vmem:[#allocation2 + $0x38] sm:$0xff]  ;;  %v1100_v58 = vld [vmem:[#allocation2 + $0x30] sm:$0xff]  ;;  %vm2167_vm9 = vcmask 891904  }
  0xef   : > { %v523_v56 = vsel %vm2163_vm11, %v520_v52, %v521_v54  ;;  %v513_v59 = vsel %vm241_vm0, %v511_v55, 0.0  ;;  %1158 = vmatprep.subr.mxu0 %v1101_v57  ;;  %1398 = vmatprep.subr.mxu1 %v1101_v57  ;;  %v543_v61 = vpop.permute.xlu0 %542  ;;  %vm2168_vm11 = vcmask 883712  }
  0xf0   : > { %v525_v60 = vsel %vm242_vm10, %v523_v56, 0.0  ;;  %v473_v62 = vpop.permute.xlu1 %472  ;;  %515 = vst.msk [vmem:[#allocation2 + $0x24] ss:$8 sm:$0x3] %vm1619_vm1, %v513_v59  ;;  %v544_v63 = vrot.slane %v543_v61, 1  ;;  %1159 = vmatpush1.msra.mxu0 %v1100_v58  ;;  %1408 = vmatpush1.msra.mxu1 %v1100_v58 }
  0xf1   : > { %527 = vst.msk [vmem:[#allocation2 + $0x25] ss:$8 sm:$0x3] %vm1619_vm1, %v525_v60  ;;  %v474_v0 = vrot.slane %v473_v62, 1 }
  0xf2   : > { %v546_v1 = vsel %vm2164_vm14, %v543_v61, %v544_v63  ;;  %vm2169_vm14 = vcmask 785408  }
  0xf3   : > { %v476_v2 = vsel %vm2165_vm8, %v473_v62, %v474_v0  ;;  %v548_v3 = vsel %vm243_vm4, %v546_v1, 0.0  ;;  %v532_v4 = vpop.permute.xlu0 %531  ;;  %vm2172_vm8 = vcmask 769024  }
  0xf4   : > { %479 = vst.msk [vmem:[#allocation2 + $0x21] ss:$8 sm:$0x3] %vm1619_vm1, %v476_v2  ;;  %v366_v5 = vpop.permute.xlu1 %365  ;;  %550 = vst.msk [vmem:[#allocation2 + $0x27] ss:$8 sm:$0x3] %vm1619_vm1, %v548_v3 }
  0xf5   : > { %v533_v6 = vrot.slane %v532_v4, 1  ;;  %v367_v8 = vrot.slane %v366_v5, 1 }
  0xf7   : > { %v535_v9 = vsel %vm2166_vm12, %v532_v4, %v533_v6  ;;  %v369_v10 = vsel %vm2167_vm9, %v366_v5, %v367_v8  ;;  %v378_v12 = vpop.permute.xlu0 %377  ;;  %vm2173_vm12 = vcmask 1039360  }
  0xf8   : > { %538 = vst.msk [vmem:[#allocation2 + $0x26] ss:$8 sm:$0x3] %vm1619_vm1, %v535_v9  ;;  %v371_v11 = vsel %vm243_vm4, %v369_v10, 0.0  ;;  %v390_v13 = vpop.permute.xlu1 %389  ;;  %v379_v14 = vrot.slane %v378_v12, 1  ;;  %v247_v10 = vld [vmem:[%s2114_s1 + $0x10] sm:$0xff] }
  0xf9   : > { %373 = vst.msk [vmem:[#allocation2 + $0x10] ss:$8 sm:$0x3] %vm1619_vm1, %v371_v11  ;;  %v391_v15 = vrot.slane %v390_v13, 1  ;;  %v248_v11 = vld [vmem:[%s2114_s1 + $0x18] sm:$0xff] }
  0xfa   : > { %v381_v16 = vsel %vm2168_vm11, %v378_v12, %v379_v14 }
  0xfb   : > { %v393_v17 = vsel %vm2169_vm14, %v390_v13, %v391_v15  ;;  %v383_v18 = vsel %vm244_vm7, %v381_v16, 0.0  ;;  %v402_v20 = vpop.permute.xlu0 %401 }
  0xfc   : > { %v395_v19 = vsel %vm241_vm0, %v393_v17, 0.0  ;;  %v425_v21 = vpop.permute.xlu1 %424  ;;  %385 = vst.msk [vmem:[#allocation2 + $0x11] ss:$8 sm:$0x3] %vm1619_vm1, %v383_v18  ;;  %v403_v22 = vrot.slane %v402_v20, 1 }
  0xfd   : > { %397 = vst.msk [vmem:[#allocation2 + $0x12] ss:$8 sm:$0x3] %vm1619_vm1, %v395_v19  ;;  %v426_v24 = vrot.slane %v425_v21, 1 }
  0xfe   : > { %v405_v25 = vsel %vm404_vm6, %v402_v20, %v403_v22  ;;  %vm2171_vm6 = vcmask 654336  }
  0xff   : > { %v428_v26 = vsel %vm427_vm3, %v425_v21, %v426_v24  ;;  %v1099_v28 = vld [vmem:[#allocation2 + $0x28] sm:$0xff]  ;;  %v1098_v29 = vld [vmem:[#allocation2 + $0x20] sm:$0xff]  ;;  %v407_v30 = vsel %vm242_vm10, %v405_v25, 0.0  ;;  %v437_v32 = vpop.permute.xlu0 %436  ;;  %vm2170_vm3 = vcmask 752640  }
 0x100   : > { %v430_v31 = vsel %vm243_vm4, %v428_v26, 0.0  ;;  %1160 = vmatprep.subr.mxu0 %v1099_v28  ;;  %1399 = vmatprep.subr.mxu1 %v1099_v28  ;;  %v449_v33 = vpop.permute.xlu1 %448  ;;  %409 = vst.msk [vmem:[#allocation2 + $0x13] ss:$8 sm:$0x3] %vm1619_vm1, %v407_v30  ;;  %v438_v34 = vrot.slane %v437_v32, 1 }
 0x101   : > { %432 = vst.msk [vmem:[#allocation2 + $0x15] ss:$8 sm:$0x3] %vm1619_vm1, %v430_v31  ;;  %v450_v35 = vrot.slane %v449_v33, 1  ;;  %1161 = vmatpush1.msra.mxu0 %v1098_v29  ;;  %1409 = vmatpush1.msra.mxu1 %v1098_v29 }
 0x102   : > { %v440_v36 = vsel %vm2170_vm3, %v437_v32, %v438_v34 }
 0x103   : > { %v452_v37 = vsel %vm2171_vm6, %v449_v33, %v450_v35  ;;  %v442_v38 = vsel %vm244_vm7, %v440_v36, 0.0  ;;  %v414_v40 = vpop.permute.xlu0 %413 }
 0x104   : > { %v454_v39 = vsel %vm241_vm0, %v452_v37, 0.0  ;;  %v284_v41 = vpop.permute.xlu1 %283  ;;  %444 = vst.msk [vmem:[#allocation2 + $0x16] ss:$8 sm:$0x3] %vm1619_vm1, %v442_v38  ;;  %v415_v42 = vrot.slane %v414_v40, 1 }
 0x105   : > { %456 = vst.msk [vmem:[#allocation2 + $0x17] ss:$8 sm:$0x3] %vm1619_vm1, %v454_v39  ;;  %v285_v43 = vrot.slane %v284_v41, 1 }
 0x106   : > { %v417_v44 = vsel %vm2172_vm8, %v414_v40, %v415_v42 }
 0x107   : > { %v287_v45 = vsel %vm2173_vm12, %v284_v41, %v285_v43  ;;  %420 = vst.msk [vmem:[#allocation2 + $0x14] ss:$8 sm:$0x3] %vm1619_vm1, %v417_v44 }
 0x108   : > { %v289_v46 = vsel %vm242_vm10, %v287_v45, 0.0 }
 0x109   : > { %291 = vst.msk [vmem:[#allocation2 + $0x1] ss:$8 sm:$0x3] %vm1619_vm1, %v289_v46  ;;  %v307_v47 = vpop.permute.xlu0 %306  ;;  %v319_v48 = vpop.permute.xlu1 %318 }
 0x10a   : > { %v308_v49 = vrot.slane %v307_v47, 1  ;;  %v320_v50 = vrot.slane %v319_v48, 1 }
 0x10c   : > { %v310_v51 = vsel %vm309_vm2, %v307_v47, %v308_v49  ;;  %v322_v52 = vsel %vm321_vm15, %v319_v48, %v320_v50  ;;  %vm2174_vm2 = vcmask 908288  }
 0x10d   : > { %v312_v53 = vsel %vm243_vm4, %v310_v51, 0.0  ;;  %v324_v54 = vsel %vm244_vm7, %v322_v52, 0.0  ;;  %v331_v55 = vpop.permute.xlu0 %330  ;;  %v343_v56 = vpop.permute.xlu1 %342  ;;  %vm2175_vm4 = vcmask 900096  }
 0x10e   : > { %314 = vst.msk [vmem:[#allocation2 + $0x3] ss:$8 sm:$0x3] %vm1619_vm1, %v312_v53  ;;  %326 = vst.msk [vmem:[#allocation2 + $0x4] ss:$8 sm:$0x3] %vm1619_vm1, %v324_v54 }
 0x10f   : > { %v332_v57 = vrot.slane %v331_v55, 1  ;;  %v344_v58 = vrot.slane %v343_v56, 1  ;;  %v1097_v59 = vld [vmem:[#allocation2 + $0x18] sm:$0xff]  ;;  %v1096_v60 = vld [vmem:[#allocation2 + $0x10] sm:$0xff] }
 0x110   : > { %1162 = vmatprep.subr.mxu0 %v1097_v59  ;;  %1400 = vmatprep.subr.mxu1 %v1097_v59 }
 0x111   : > { %v334_v61 = vsel %vm333_vm5, %v331_v55, %v332_v57  ;;  %v346_v62 = vsel %vm2174_vm2, %v343_v56, %v344_v58  ;;  %v296_v1 = vpop.permute.xlu0 %295  ;;  %v355_v2 = vpop.permute.xlu1 %354  ;;  %1163 = vmatpush1.msra.mxu0 %v1096_v60  ;;  %1410 = vmatpush1.msra.mxu1 %v1096_v60 }
 0x112   : > { %v336_v63 = vsel %vm241_vm0, %v334_v61, 0.0  ;;  %v348_v0 = vsel %vm242_vm10, %v346_v62, 0.0  ;;  %v297_v3 = vrot.slane %v296_v1, 1  ;;  %v356_v4 = vrot.slane %v355_v2, 1 }
 0x113   : > { %338 = vst.msk [vmem:[#allocation2 + $0x5] ss:$8 sm:$0x3] %vm1619_vm1, %v336_v63  ;;  %350 = vst.msk [vmem:[#allocation2 + $0x6] ss:$8 sm:$0x3] %vm1619_vm1, %v348_v0 }
 0x114   : > { %v299_v5 = vsel %vm298_vm13, %v296_v1, %v297_v3  ;;  %v358_v6 = vsel %vm2175_vm4, %v355_v2, %v356_v4  ;;  %vm1114_vm0 = vcmask 613376  }
 0x115   : > { %302 = vst.msk [vmem:[#allocation2 + $0x2] ss:$8 sm:$0x3] %vm1619_vm1, %v299_v5  ;;  %361 = vst.msk [vmem:[#allocation2 + $0x7] ss:$8 sm:$0x3] %vm1619_vm1, %v358_v6 }
 0x11c   : > { %v1095_v8 = vld [vmem:[#allocation2 + $0x8] sm:$0xff]  ;;  %v1094_v9 = vld [vmem:[#allocation2] sm:$0xff] }
 0x11d   : > { %1164 = vmatprep.subr.mxu0 %v1095_v8  ;;  %1401 = vmatprep.subr.mxu1 %v1095_v8 }
 0x11e   : > { %1165 = vmatpush1.msra.mxu0 %v1094_v9  ;;  %1411 = vmatpush1.msra.mxu1 %v1094_v9 }
 0x11f   : > { %1385 = vmatmul.mubr.msk.f32.vlgmr.msra.gmra.mxu0 %vm1114_vm0, %v245_v23  ;;  %1387 = vmatmul.mubr.msk.f32.vlgmr.msra.gmra.mxu1 %vm1114_vm0, %v247_v10 }
 0x120   : > { %1204 = vmatprep.mubr.f32.mxu0 %v1513_v7  ;;  %1216 = vmatprep.mubr.f32.mxu1 %v1513_v7  ;;  %v261_v12 = vpop.permute.xlu1 %260  ;;  %v256_v13 = vpop.permute.xlu0 %255 }
 0x123   : > { %1386 = vmatmul.mubr.msk.f32.gmra.mxu0 %vm1114_vm0, %v246_v27  ;;  %1388 = vmatmul.mubr.msk.f32.gmra.mxu1 %vm1114_vm0, %v248_v11 }
 0x124   : > { %v266_v14 = vpop.permute.xlu1 %265  ;;  %v271_v20 = vpop.permute.xlu0 %270 }
 0x1df   : > { %v1200_v15 = vpop.f32.mrf.mxu0  ;;  %v1212_v7 = vpop.f32.mrf.mxu1 }
 0x1e0   : > { %v1201_v16 = vadd.f32 %v1200_v15, %v256_v13  ;;  %v1213_v17 = vadd.f32 %v1212_v7, %v266_v14 }
 0x1e1   : > { %v1202_v18 = vpop.f32.mrf.mxu0  ;;  %v1214_v19 = vpop.f32.mrf.mxu1 }
 0x1e2   : > { %1223 = vst [vmem:[%s238_s27] sm:$0xff] %v1201_v16  ;;  %1227 = vst [vmem:[%s238_s27 + $0x20] sm:$0xff] %v1213_v17  ;;  %v1203_v21 = vadd.f32 %v1202_v18, %v256_v13  ;;  %v1215_v22 = vadd.f32 %v1214_v19, %v266_v14 }
 0x1e3   : > { %v1206_v24 = vpop.f32.mrf.mxu0  ;;  %v1218_v25 = vpop.f32.mrf.mxu1 }
 0x1e4   : > { %1224 = vst [vmem:[%s238_s27 + $0x8] sm:$0xff] %v1203_v21  ;;  %1228 = vst [vmem:[%s238_s27 + $0x28] sm:$0xff] %v1215_v22  ;;  %v1207_v26 = vadd.f32 %v1206_v24, %v261_v12  ;;  %v1219_v28 = vadd.f32 %v1218_v25, %v271_v20 }
 0x1e5   : > { %v1208_v29 = vpop.f32.mrf.mxu0  ;;  %v1220_v30 = vpop.f32.mrf.mxu1 }
 0x1e6   : > { %1225 = vst [vmem:[%s238_s27 + $0x10] sm:$0xff] %v1207_v26  ;;  %1229 = vst [vmem:[%s238_s27 + $0x30] sm:$0xff] %v1219_v28  ;;  %v1209_v31 = vadd.f32 %v1208_v29, %v261_v12  ;;  %v1221_v32 = vadd.f32 %v1220_v30, %v271_v20 }
 0x1e8   : > { %1226 = vst [vmem:[%s238_s27 + $0x18] sm:$0xff] %v1209_v31  ;;  %1230 = vst [vmem:[%s238_s27 + $0x38] sm:$0xff] %v1221_v32 }
 0x1e9 PF: > { %s14_s17 = sadd.s32 1, %s1487_s17   ;;  %s2176_s15 = smov %s1483_s16 }
 0x1ea   : > { %p11_p5 = scmp.ge.s32.totalorder %s14_s17, 4   ;;  %s2177_s16 = smov %s2179_s18 }
 0x1ec   :  { %13 = sbr.rel (!%p11_p5) target bundleno = 2 (0x2), region = 145 }

</bundles_post_ra>
